<compile_context>
chip_gen: v7x
topology: tpu7x:2x2x1
jax: 0.10.0
libtpu: 0.0.40
codegen_flags: <defaults>
</compile_context>

<pallas_src>
import jax
import jax.numpy as jnp
import numpy as np
from jax import lax
from jax.experimental import pallas as pl
from jax.experimental.pallas import tpu as pltpu

INPUT_DIM = 2
HIDDEN_DIM = 32          # small "hidden_dim" consistent with the module
LATENT_DIM = 16          # small "latent_dim"
THETA_HIDDEN = 128       # fixed in the module
THETA_OUT = 4            # fixed in the module
CHUNK_SIZE = 1000        # fixed in PointNetEmbedding.__init__ (pool chunk_size=1000)
S_PAD = 1024             # per-chunk lane extent inside the kernel (128-aligned, pow2)
MAX_CHUNKS_PER_STEP = 32 # chunks processed per grid step


def _mlp1_local_attn_kernel(x_ref,                # (DIN, kc*S_PAD) chunks on lanes
                            w1t_ref, b1_ref,      # (H, DIN) f32, (H, 1) f32
                            w2t_ref, b2_ref,      # (H, H)  act,  (H, 1) f32
                            w3t_ref, b3_ref,      # (H, H)  act,  (H, 1) f32
                            wl_ref, bl_ref,       # (1, H)  act,  (1, 1) f32
                            out_ref):             # (kc, H) f32 chunk summaries
    kc, _ = out_ref.shape
    din, n_lanes = x_ref.shape
    act_dtype = w2t_ref.dtype

    # ---- mlp1 layer 1 on the VPU (fan-in = 2 -> skip the MXU), fused over chunks ----
    h = b1_ref[...]
    w1t = w1t_ref[...]
    for d in range(din):                                  # static, DIN == 2
        h = h + w1t[:, d:d + 1] * x_ref[d:d + 1, :]       # (H, kc*S_PAD) f32
    h = jnp.maximum(h, 0.0).astype(act_dtype)

    # ---- mlp1 layers 2/3 + sigmoid, fused across all kc chunks (one MXU pass each) ----
    h = jnp.dot(w2t_ref[...], h, preferred_element_type=jnp.float32) + b2_ref[...]
    h = jnp.maximum(h, 0.0).astype(act_dtype)
    h = jnp.dot(w3t_ref[...], h, preferred_element_type=jnp.float32) + b3_ref[...]
    h = jax.nn.sigmoid(h.astype(act_dtype))               # (H, kc*S_PAD) act dtype

    # ---- local-attention logits for all chunks at once; softmax math stays f32 ----
    s = jnp.dot(wl_ref[...], h, preferred_element_type=jnp.float32) + bl_ref[...]
    lane = lax.broadcasted_iota(jnp.int32, (1, n_lanes), 1)
    pad_lane = (lane & (S_PAD - 1)) >= CHUNK_SIZE          # S_PAD is a power of two
    s = jnp.where(pad_lane, jnp.float32(-1e30), s)         # pad lanes -> exp() == 0

    # ---- per-chunk softmax + weighted sum on 128-aligned lane slices ----
    # Only tiny (1, S_PAD) / (1, H) values are live per iteration, so a static
    # loop is safe (no vreg-pressure blow-up like the old fully-unrolled loop).
    nums, dens = [], []
    for k in range(kc):
        sk = s[:, k * S_PAD:(k + 1) * S_PAD]               # (1, S_PAD) f32
        hk = h[:, k * S_PAD:(k + 1) * S_PAD]               # (H, S_PAD) act dtype
        e = jnp.exp(sk - jnp.max(sk, axis=1, keepdims=True))
        dens.append(jnp.sum(e, axis=1, keepdims=True))     # (1, 1) f32
        nums.append(lax.dot_general(                       # MXU NT contraction over S_PAD
            e.astype(act_dtype), hk, (((1,), (1,)), ((), ())),
            preferred_element_type=jnp.float32))            # (1, H) f32
    num = jnp.concatenate(nums, axis=0)                     # (kc, H)
    den = jnp.concatenate(dens, axis=0)                     # (kc, 1)
    out_ref[...] = num / den                                 # single batched store


def _fast_bf16_supported():
    try:
        kind = jax.devices()[0].device_kind.lower()
    except Exception:
        return False
    return ("v6" in kind) or ("v7" in kind)


def pointnet_embedding(x, params, act_dtype=None):
    """x: (B, N, INPUT_DIM) float32.  Returns (latent (B, L), theta (B, 4))."""
    B, N, din = x.shape
    assert din == INPUT_DIM
    assert N % CHUNK_SIZE == 0, "num_events must be divisible by chunk_size (PyTorch .view requirement)"
    C = N // CHUNK_SIZE
    H = HIDDEN_DIM

    if act_dtype is None:
        # bf16 activations only where VPU/EUP/MXU are bf16-native (v6e/v7x);
        # on v5e (no bf16 VPU/EUP) bf16 casts would only add VALU work.
        act_dtype = jnp.bfloat16 if _fast_bf16_supported() else jnp.float32

    # Chunks per grid step; pad C to a multiple of kc (zero chunks, discarded)
    # instead of degrading to kc == 1 for awkward C.
    kc = min(MAX_CHUNKS_PER_STEP, C)
    if B == 1 and C > 1:
        kc = min(kc, -(-C // 2))     # keep >= 2 grid steps so both v7x TCs get work
    cb = -(-C // kc)
    C_pad = cb * kc

    # Points-on-lanes layout with the kc chunks of a grid step concatenated on the
    # lane axis, each chunk zero-padded 1000 -> 1024 lanes: (B,N,2) -> (B,cb,2,kc*1024).
    # NOTE: this repack materializes one extra HBM copy of x; acceptable here
    # (the kernel is compute-bound).
    # TODO(synk): have the upstream producer emit this layout directly.
    xt = jnp.transpose(x.reshape(B, C, CHUNK_SIZE, din), (0, 1, 3, 2))
    xt = jnp.pad(xt, ((0, 0), (0, C_pad - C), (0, 0), (0, S_PAD - CHUNK_SIZE)))
    xt = jnp.transpose(xt.reshape(B, cb, kc, din, S_PAD), (0, 1, 3, 2, 4))
    x_packed = xt.reshape(B, cb, din, kc * S_PAD)

    # Only mlp1 + local-attention params go to the kernel (epilogue stays in JAX).
    kernel_params = [
        params["w1"].T.astype(jnp.float32), params["b1"].T.astype(jnp.float32),
        params["w2"].T.astype(act_dtype),   params["b2"].T.astype(jnp.float32),
        params["w3"].T.astype(act_dtype),   params["b3"].T.astype(jnp.float32),
        params["wl"].T.astype(act_dtype),   params["bl"].astype(jnp.float32),
    ]
    param_specs = [pl.BlockSpec(p.shape, lambda b, c: (0, 0)) for p in kernel_params]

    flops_per_chunk = (2 * din * H * S_PAD       # layer-1 broadcast FMAs
                       + 2 * 2 * H * H * S_PAD   # layers 2 & 3
                       + 2 * H * S_PAD           # local-attention logits
                       + 2 * H * S_PAD)          # weighted sum
    transc_per_chunk = (H + 1) * S_PAD           # sigmoid + softmax exp
    bytes_accessed = (int(x_packed.size) * x_packed.dtype.itemsize
                      + sum(int(p.size) * p.dtype.itemsize for p in kernel_params)
                      + B * C_pad * H * 4)
    cost = pl.CostEstimate(flops=int(B * C_pad * flops_per_chunk),
                           transcendentals=int(B * C_pad * transc_per_chunk),
                           bytes_accessed=int(bytes_accessed))

    summaries = pl.pallas_call(
        _mlp1_local_attn_kernel,
        out_shape=jax.ShapeDtypeStruct((B, cb, kc, H), jnp.float32),
        grid_spec=pltpu.PrefetchScalarGridSpec(
            num_scalar_prefetch=0,
            grid=(B, cb),
            in_specs=[pl.BlockSpec((None, None, din, kc * S_PAD),
                                   lambda b, c: (b, c, 0, 0))] + param_specs,
            out_specs=pl.BlockSpec((None, None, kc, H),
                                   lambda b, c: (b, c, 0, 0)),
        ),
        compiler_params=pltpu.CompilerParams(
            dimension_semantics=("parallel", "parallel"),
            vmem_limit_bytes=48 * 1024 * 1024),
        cost_estimate=cost,
    )(x_packed, *kernel_params)

    cs = summaries.reshape(B, C_pad, H)[:, :C, :]            # drop padded chunks

    # ---- tiny per-batch epilogue in plain JAX (global attention + mlp2 + theta) ----
    gw = jax.nn.softmax(cs @ params["wg"] + params["bg"], axis=1)    # (B, C, 1)
    pooled = jnp.sum(cs * gw, axis=1)                                # (B, H)
    y = jnp.maximum(pooled @ params["w4"] + params["b4"], 0.0)
    latent = y @ params["w5"] + params["b5"]                         # (B, L)
    t = jnp.maximum(latent @ params["w6"] + params["b6"], 0.0)
    theta = t @ params["w7"] + params["b7"]                          # (B, 4)
    return latent, theta


def init_params(key):
    """Deterministic PyTorch-style Linear init: U(-1/sqrt(fan_in), 1/sqrt(fan_in))."""
    def linear(k, fan_in, fan_out):
        k1, k2 = jax.random.split(k)
        bound = 1.0 / np.sqrt(fan_in)
        w = jax.random.uniform(k1, (fan_in, fan_out), jnp.float32, -bound, bound)
        b = jax.random.uniform(k2, (1, fan_out), jnp.float32, -bound, bound)
        return w, b

    keys = jax.random.split(key, 9)
    p = {}
    p["w1"], p["b1"] = linear(keys[0], INPUT_DIM, HIDDEN_DIM)
    p["w2"], p["b2"] = linear(keys[1], HIDDEN_DIM, HIDDEN_DIM)
    p["w3"], p["b3"] = linear(keys[2], HIDDEN_DIM, HIDDEN_DIM)
    p["wl"], p["bl"] = linear(keys[3], HIDDEN_DIM, 1)     # local_attn
    p["wg"], p["bg"] = linear(keys[4], HIDDEN_DIM, 1)     # global_attn
    p["w4"], p["b4"] = linear(keys[5], HIDDEN_DIM, HIDDEN_DIM)
    p["w5"], p["b5"] = linear(keys[6], HIDDEN_DIM, LATENT_DIM)
    p["w6"], p["b6"] = linear(keys[7], LATENT_DIM, THETA_HIDDEN)
    p["w7"], p["b7"] = linear(keys[8], THETA_HIDDEN, THETA_OUT)
    return p


def reference(x, p):
    """Pure-JAX reference reproducing the PyTorch forward semantics."""
    B, N, _ = x.shape
    C = N // CHUNK_SIZE
    h = jnp.maximum(x @ p["w1"] + p["b1"], 0.0)
    h = jnp.maximum(h @ p["w2"] + p["b2"], 0.0)
    h = jax.nn.sigmoid(h @ p["w3"] + p["b3"])                       # (B, N, H)
    h = h.reshape(B, C, CHUNK_SIZE, HIDDEN_DIM)
    lw = jax.nn.softmax(h @ p["wl"] + p["bl"], axis=2)              # (B, C, S, 1)
    cs = (h * lw).sum(axis=2)                                       # (B, C, H)
    gw = jax.nn.softmax(cs @ p["wg"] + p["bg"], axis=1)             # (B, C, 1)
    pooled = (cs * gw).sum(axis=1)                                  # (B, H)
    y = jnp.maximum(pooled @ p["w4"] + p["b4"], 0.0)
    latent = y @ p["w5"] + p["b5"]                                  # (B, L)
    t = jnp.maximum(latent @ p["w6"] + p["b6"], 0.0)
    theta = t @ p["w7"] + p["b7"]                                   # (B, 4)
    return latent, theta


if __name__ == "__main__":
    key = jax.random.PRNGKey(0)
    k_param, k_x = jax.random.split(key)
    params = init_params(k_param)

    B, N = 2, 2 * CHUNK_SIZE                      # 2 chunks per batch row
    x = jax.random.normal(k_x, (B, N, INPUT_DIM), dtype=jnp.float32)

    fwd = jax.jit(pointnet_embedding)
    latent, theta = fwd(x, params)
    latent = jax.block_until_ready(latent)
    theta = jax.block_until_ready(theta)

    with jax.default_matmul_precision("highest"):
        latent_ref, theta_ref = reference(x, params)

    # f32 activation path: tight tolerance; bf16 path (v6e/v7x): looser.
    tol = 4e-2 if _fast_bf16_supported() else 2e-3
    np.testing.assert_allclose(np.asarray(latent), np.asarray(latent_ref),
                               rtol=tol, atol=tol)
    np.testing.assert_allclose(np.asarray(theta), np.asarray(theta_ref),
                               rtol=tol, atol=tol)

    assert latent.shape == (B, LATENT_DIM) and theta.shape == (B, THETA_OUT)
    print("KERNEL_OK")
</pallas_src>

<mosaic_0001>
module attributes {stable_mosaic.version = 11 : i64} {
  func.func @_mlp1_local_attn_kernel(%arg0: i32, %arg1: i32, %arg2: memref<1x1x2x2048xf32, #tpu.memory_space<vmem>>, %arg3: memref<32x2xf32, #tpu.memory_space<vmem>>, %arg4: memref<32x1xf32, #tpu.memory_space<vmem>>, %arg5: memref<32x32xf32, #tpu.memory_space<vmem>>, %arg6: memref<32x1xf32, #tpu.memory_space<vmem>>, %arg7: memref<32x32xf32, #tpu.memory_space<vmem>>, %arg8: memref<32x1xf32, #tpu.memory_space<vmem>>, %arg9: memref<1x32xf32, #tpu.memory_space<vmem>>, %arg10: memref<1x1xf32, #tpu.memory_space<vmem>>, %arg11: memref<1x1x2x32xf32, #tpu.memory_space<vmem>>) attributes {dimension_semantics = [#tpu.dimension_semantics<parallel>, #tpu.dimension_semantics<parallel>], iteration_bounds = array<i64: 2, 1>, scalar_prefetch = 0 : i64, scratch_operands = 0 : i64, tpu.core_type = #tpu.core_type<tc>, window_params = [{transform_indices = @transform_0, window_bounds = array<i64: 1, 1, 2, 2048>}, {pipeline_mode = #tpu.pipeline_mode<synchronous>, transform_indices = @transform_1, window_bounds = array<i64: 32, 2>}, {pipeline_mode = #tpu.pipeline_mode<synchronous>, transform_indices = @transform_2, window_bounds = array<i64: 32, 1>}, {pipeline_mode = #tpu.pipeline_mode<synchronous>, transform_indices = @transform_3, window_bounds = array<i64: 32, 32>}, {pipeline_mode = #tpu.pipeline_mode<synchronous>, transform_indices = @transform_4, window_bounds = array<i64: 32, 1>}, {pipeline_mode = #tpu.pipeline_mode<synchronous>, transform_indices = @transform_5, window_bounds = array<i64: 32, 32>}, {pipeline_mode = #tpu.pipeline_mode<synchronous>, transform_indices = @transform_6, window_bounds = array<i64: 32, 1>}, {pipeline_mode = #tpu.pipeline_mode<synchronous>, transform_indices = @transform_7, window_bounds = array<i64: 1, 32>}, {pipeline_mode = #tpu.pipeline_mode<synchronous>, transform_indices = @transform_8, window_bounds = array<i64: 1, 1>}, {transform_indices = @transform_9, window_bounds = array<i64: 1, 1, 2, 32>}]} {
    %c0 = arith.constant 0 : index
    %c0_0 = arith.constant 0 : index
    %0 = vector.load %arg4[%c0, %c0_0] : memref<32x1xf32, #tpu.memory_space<vmem>>, vector<32x1xf32>
    %c0_1 = arith.constant 0 : index
    %c0_2 = arith.constant 0 : index
    %1 = vector.load %arg3[%c0_1, %c0_2] : memref<32x2xf32, #tpu.memory_space<vmem>>, vector<32x2xf32>
    %2 = vector.extract_strided_slice %1 {offsets = [0, 0], sizes = [32, 1], strides = [1, 1]} : vector<32x2xf32> to vector<32x1xf32>
    %c0_3 = arith.constant 0 : index
    %c0_4 = arith.constant 0 : index
    %c0_5 = arith.constant 0 : index
    %c0_6 = arith.constant 0 : index
    %3 = vector.load %arg2[%c0_3, %c0_4, %c0_5, %c0_6] : memref<1x1x2x2048xf32, #tpu.memory_space<vmem>>, vector<1x1x1x2048xf32>
    %4 = vector.shape_cast %3 : vector<1x1x1x2048xf32> to vector<1x2048xf32>
    %5 = vector.broadcast %2 : vector<32x1xf32> to vector<32x2048xf32>
    %6 = vector.broadcast %4 : vector<1x2048xf32> to vector<32x2048xf32>
    %7 = arith.mulf %5, %6 : vector<32x2048xf32>
    %8 = vector.broadcast %0 : vector<32x1xf32> to vector<32x2048xf32>
    %9 = arith.addf %8, %7 : vector<32x2048xf32>
    %10 = vector.extract_strided_slice %1 {offsets = [0, 1], sizes = [32, 1], strides = [1, 1]} : vector<32x2xf32> to vector<32x1xf32>
    %c0_7 = arith.constant 0 : index
    %c0_8 = arith.constant 0 : index
    %c1 = arith.constant 1 : index
    %c0_9 = arith.constant 0 : index
    %11 = vector.load %arg2[%c0_7, %c0_8, %c1, %c0_9] : memref<1x1x2x2048xf32, #tpu.memory_space<vmem>>, vector<1x1x1x2048xf32>
    %12 = vector.shape_cast %11 : vector<1x1x1x2048xf32> to vector<1x2048xf32>
    %13 = vector.broadcast %10 : vector<32x1xf32> to vector<32x2048xf32>
    %14 = vector.broadcast %12 : vector<1x2048xf32> to vector<32x2048xf32>
    %15 = arith.mulf %13, %14 : vector<32x2048xf32>
    %16 = arith.addf %9, %15 : vector<32x2048xf32>
    %cst = arith.constant 0.000000e+00 : f32
    %17 = vector.broadcast %cst : f32 to vector<32x2048xf32>
    %18 = arith.maximumf %16, %17 : vector<32x2048xf32>
    %c0_10 = arith.constant 0 : index
    %c0_11 = arith.constant 0 : index
    %19 = vector.load %arg5[%c0_10, %c0_11] : memref<32x32xf32, #tpu.memory_space<vmem>>, vector<32x32xf32>
    %cst_12 = arith.constant dense<0.000000e+00> : vector<32x2048xf32>
    %20 = tpu.matmul %19, %18, %cst_12 {dimension_numbers = #tpu.dot_dimension_numbers<[1], [0], [0], [1], [0, 0, 1, 1], [], []>} : vector<32x32xf32>, vector<32x2048xf32>, vector<32x2048xf32> -> vector<32x2048xf32>
    %c0_13 = arith.constant 0 : index
    %c0_14 = arith.constant 0 : index
    %21 = vector.load %arg6[%c0_13, %c0_14] : memref<32x1xf32, #tpu.memory_space<vmem>>, vector<32x1xf32>
    %22 = vector.broadcast %21 : vector<32x1xf32> to vector<32x2048xf32>
    %23 = arith.addf %20, %22 : vector<32x2048xf32>
    %cst_15 = arith.constant 0.000000e+00 : f32
    %24 = vector.broadcast %cst_15 : f32 to vector<32x2048xf32>
    %25 = arith.maximumf %23, %24 : vector<32x2048xf32>
    %c0_16 = arith.constant 0 : index
    %c0_17 = arith.constant 0 : index
    %26 = vector.load %arg7[%c0_16, %c0_17] : memref<32x32xf32, #tpu.memory_space<vmem>>, vector<32x32xf32>
    %cst_18 = arith.constant dense<0.000000e+00> : vector<32x2048xf32>
    %27 = tpu.matmul %26, %25, %cst_18 {dimension_numbers = #tpu.dot_dimension_numbers<[1], [0], [0], [1], [0, 0, 1, 1], [], []>} : vector<32x32xf32>, vector<32x2048xf32>, vector<32x2048xf32> -> vector<32x2048xf32>
    %c0_19 = arith.constant 0 : index
    %c0_20 = arith.constant 0 : index
    %28 = vector.load %arg8[%c0_19, %c0_20] : memref<32x1xf32, #tpu.memory_space<vmem>>, vector<32x1xf32>
    %29 = vector.broadcast %28 : vector<32x1xf32> to vector<32x2048xf32>
    %30 = arith.addf %27, %29 : vector<32x2048xf32>
    %31 = arith.negf %30 : vector<32x2048xf32>
    %32 = math.exp %31 : vector<32x2048xf32>
    %cst_21 = arith.constant 1.000000e+00 : f32
    %33 = vector.broadcast %cst_21 : f32 to vector<32x2048xf32>
    %34 = arith.addf %33, %32 : vector<32x2048xf32>
    %35 = arith.divf %33, %34 : vector<32x2048xf32>
    %c0_22 = arith.constant 0 : index
    %c0_23 = arith.constant 0 : index
    %36 = vector.load %arg9[%c0_22, %c0_23] : memref<1x32xf32, #tpu.memory_space<vmem>>, vector<1x32xf32>
    %cst_24 = arith.constant dense<0.000000e+00> : vector<1x2048xf32>
    %37 = tpu.matmul %36, %35, %cst_24 {dimension_numbers = #tpu.dot_dimension_numbers<[1], [0], [0], [1], [0, 0, 1, 1], [], []>} : vector<1x32xf32>, vector<32x2048xf32>, vector<1x2048xf32> -> vector<1x2048xf32>
    %c0_25 = arith.constant 0 : index
    %c0_26 = arith.constant 0 : index
    %38 = vector.load %arg10[%c0_25, %c0_26] : memref<1x1xf32, #tpu.memory_space<vmem>>, vector<1x1xf32>
    %39 = vector.broadcast %38 : vector<1x1xf32> to vector<1x2048xf32>
    %40 = arith.addf %37, %39 : vector<1x2048xf32>
    %41 = tpu.iota {dimensions = array<i32: 1>} : vector<1x2048xi32>
    %c1023_i32 = arith.constant 1023 : i32
    %42 = vector.broadcast %c1023_i32 : i32 to vector<1x2048xi32>
    %43 = arith.andi %41, %42 : vector<1x2048xi32>
    %c1000_i32 = arith.constant 1000 : i32
    %44 = vector.broadcast %c1000_i32 : i32 to vector<1x2048xi32>
    %45 = arith.cmpi sge, %43, %44 : vector<1x2048xi32>
    %cst_27 = arith.constant -1.000000e+30 : f32
    %46 = vector.broadcast %cst_27 : f32 to vector<1x2048xf32>
    %47 = arith.select %45, %46, %40 : vector<1x2048xi1>, vector<1x2048xf32>
    %48 = vector.extract_strided_slice %47 {offsets = [0, 0], sizes = [1, 1024], strides = [1, 1]} : vector<1x2048xf32> to vector<1x1024xf32>
    %49 = vector.extract_strided_slice %35 {offsets = [0, 0], sizes = [32, 1024], strides = [1, 1]} : vector<32x2048xf32> to vector<32x1024xf32>
    %cst_28 = arith.constant dense<0xFF800000> : vector<1xf32>
    %50 = vector.multi_reduction <maximumf>, %48, %cst_28 [1] : vector<1x1024xf32> to vector<1xf32>
    %51 = vector.shape_cast %50 : vector<1xf32> to vector<1x1xf32>
    %52 = vector.broadcast %51 : vector<1x1xf32> to vector<1x1024xf32>
    %53 = arith.subf %48, %52 : vector<1x1024xf32>
    %54 = math.exp %53 : vector<1x1024xf32>
    %cst_29 = arith.constant dense<0.000000e+00> : vector<1xf32>
    %55 = vector.multi_reduction <add>, %54, %cst_29 [1] : vector<1x1024xf32> to vector<1xf32>
    %56 = vector.shape_cast %55 : vector<1xf32> to vector<1x1xf32>
    %cst_30 = arith.constant dense<0.000000e+00> : vector<1x32xf32>
    %57 = tpu.matmul %54, %49, %cst_30 {dimension_numbers = #tpu.dot_dimension_numbers<[1], [1], [0], [0], [0, 0, 1, 0], [], []>} : vector<1x1024xf32>, vector<32x1024xf32>, vector<1x32xf32> -> vector<1x32xf32>
    %58 = vector.extract_strided_slice %47 {offsets = [0, 1024], sizes = [1, 1024], strides = [1, 1]} : vector<1x2048xf32> to vector<1x1024xf32>
    %59 = vector.extract_strided_slice %35 {offsets = [0, 1024], sizes = [32, 1024], strides = [1, 1]} : vector<32x2048xf32> to vector<32x1024xf32>
    %cst_31 = arith.constant dense<0xFF800000> : vector<1xf32>
    %60 = vector.multi_reduction <maximumf>, %58, %cst_31 [1] : vector<1x1024xf32> to vector<1xf32>
    %61 = vector.shape_cast %60 : vector<1xf32> to vector<1x1xf32>
    %62 = vector.broadcast %61 : vector<1x1xf32> to vector<1x1024xf32>
    %63 = arith.subf %58, %62 : vector<1x1024xf32>
    %64 = math.exp %63 : vector<1x1024xf32>
    %cst_32 = arith.constant dense<0.000000e+00> : vector<1xf32>
    %65 = vector.multi_reduction <add>, %64, %cst_32 [1] : vector<1x1024xf32> to vector<1xf32>
    %66 = vector.shape_cast %65 : vector<1xf32> to vector<1x1xf32>
    %cst_33 = arith.constant dense<0.000000e+00> : vector<1x32xf32>
    %67 = tpu.matmul %64, %59, %cst_33 {dimension_numbers = #tpu.dot_dimension_numbers<[1], [1], [0], [0], [0, 0, 1, 0], [], []>} : vector<1x1024xf32>, vector<32x1024xf32>, vector<1x32xf32> -> vector<1x32xf32>
    %68 = tpu.concatenate %57, %67 in 0 : vector<1x32xf32>, vector<1x32xf32> -> vector<2x32xf32>
    %69 = tpu.concatenate %56, %66 in 0 : vector<1x1xf32>, vector<1x1xf32> -> vector<2x1xf32>
    %70 = vector.broadcast %69 : vector<2x1xf32> to vector<2x32xf32>
    %71 = arith.divf %68, %70 : vector<2x32xf32>
    %c0_34 = arith.constant 0 : index
    %c0_35 = arith.constant 0 : index
    %c0_36 = arith.constant 0 : index
    %c0_37 = arith.constant 0 : index
    %72 = vector.load %arg11[%c0_34, %c0_35, %c0_36, %c0_37] : memref<1x1x2x32xf32, #tpu.memory_space<vmem>>, vector<1x1x2x32xf32>
    %73 = vector.shape_cast %72 : vector<1x1x2x32xf32> to vector<2x32xf32>
    %74 = vector.shape_cast %71 : vector<2x32xf32> to vector<1x1x2x32xf32>
    tpu.vector_store %arg11[%c0_34, %c0_35, %c0_36, %c0_37], %74 {strides = array<i32>} : memref<1x1x2x32xf32, #tpu.memory_space<vmem>>, vector<1x1x2x32xf32>,
    return
  }
  func.func @transform_0(%arg0: i32, %arg1: i32) -> (i32, i32, i32, i32) {
    %c0_i32 = arith.constant 0 : i32
    %c0_i32_0 = arith.constant 0 : i32
    %c0_i32_1 = arith.constant 0 : i32
    return %arg0, %arg1, %c0_i32, %c0_i32_0 : i32, i32, i32, i32
  }
  func.func @transform_1(%arg0: i32, %arg1: i32) -> (i32, i32) {
    %c0_i32 = arith.constant 0 : i32
    %c0_i32_0 = arith.constant 0 : i32
    %c0_i32_1 = arith.constant 0 : i32
    return %c0_i32, %c0_i32_0 : i32, i32
  }
  func.func @transform_2(%arg0: i32, %arg1: i32) -> (i32, i32) {
    %c0_i32 = arith.constant 0 : i32
    %c0_i32_0 = arith.constant 0 : i32
    %c0_i32_1 = arith.constant 0 : i32
    return %c0_i32, %c0_i32_0 : i32, i32
  }
  func.func @transform_3(%arg0: i32, %arg1: i32) -> (i32, i32) {
    %c0_i32 = arith.constant 0 : i32
    %c0_i32_0 = arith.constant 0 : i32
    %c0_i32_1 = arith.constant 0 : i32
    return %c0_i32, %c0_i32_0 : i32, i32
  }
  func.func @transform_4(%arg0: i32, %arg1: i32) -> (i32, i32) {
    %c0_i32 = arith.constant 0 : i32
    %c0_i32_0 = arith.constant 0 : i32
    %c0_i32_1 = arith.constant 0 : i32
    return %c0_i32, %c0_i32_0 : i32, i32
  }
  func.func @transform_5(%arg0: i32, %arg1: i32) -> (i32, i32) {
    %c0_i32 = arith.constant 0 : i32
    %c0_i32_0 = arith.constant 0 : i32
    %c0_i32_1 = arith.constant 0 : i32
    return %c0_i32, %c0_i32_0 : i32, i32
  }
  func.func @transform_6(%arg0: i32, %arg1: i32) -> (i32, i32) {
    %c0_i32 = arith.constant 0 : i32
    %c0_i32_0 = arith.constant 0 : i32
    %c0_i32_1 = arith.constant 0 : i32
    return %c0_i32, %c0_i32_0 : i32, i32
  }
  func.func @transform_7(%arg0: i32, %arg1: i32) -> (i32, i32) {
    %c0_i32 = arith.constant 0 : i32
    %c0_i32_0 = arith.constant 0 : i32
    %c0_i32_1 = arith.constant 0 : i32
    return %c0_i32, %c0_i32_0 : i32, i32
  }
  func.func @transform_8(%arg0: i32, %arg1: i32) -> (i32, i32) {
    %c0_i32 = arith.constant 0 : i32
    %c0_i32_0 = arith.constant 0 : i32
    %c0_i32_1 = arith.constant 0 : i32
    return %c0_i32, %c0_i32_0 : i32, i32
  }
  func.func @transform_9(%arg0: i32, %arg1: i32) -> (i32, i32, i32, i32) {
    %c0_i32 = arith.constant 0 : i32
    %c0_i32_0 = arith.constant 0 : i32
    %c0_i32_1 = arith.constant 0 : i32
    return %arg0, %arg1, %c0_i32, %c0_i32_0 : i32, i32, i32, i32
  }
}

</mosaic_0001>

<bundles_post_ra>
// kernel: pointnet_embedding.1
= control target key start
LH: loop header
LB: loop body
LE: loop exit
PB: predicated region body
PF: predicated region fallthrough
CT: control target
= control target key end

     0   :  { %s5119_s11 = smov 0   ;;  %s5121_s12 = smov 0   ;;  %s6430_s0 = inlined_call_operand.vmem [shape: f32[2,1,2,2048], index: 0, kind: input, shape index: {}]   ;;  %s6431_s1 = inlined_call_operand.vmem [shape: f32[32,2], index: 1, kind: input, shape index: {}]   ;;  %s6432_s2 = inlined_call_operand.vmem [shape: f32[32,1], index: 2, kind: input, shape index: {}]   ;;  %s6433_s3 = inlined_call_operand.vmem [shape: f32[32,32], index: 3, kind: input, shape index: {}]   ;;  %s6434_s4 = inlined_call_operand.vmem [shape: f32[32,1], index: 4, kind: input, shape index: {}]   ;;  %s6435_s5 = inlined_call_operand.vmem [shape: f32[32,32], index: 5, kind: input, shape index: {}]   ;;  %s6436_s6 = inlined_call_operand.vmem [shape: f32[32,1], index: 6, kind: input, shape index: {}]   ;;  %s6437_s7 = inlined_call_operand.vmem [shape: f32[1,32], index: 7, kind: input, shape index: {}]   ;;  %s6438_s8 = inlined_call_operand.<no memory space> [shape: f32[1,1], index: 8, kind: input, shape index: {}]   ;;  %s6439_s9 = inlined_call_operand.vmem [shape: f32[2,1,2,32], index: 9, kind: output, shape index: {}]  }
   0x1   :  { %v14_v0 = vstv %s6438_s8  ;;  %s5123_s13 = smov 0  }
   0x2   :  { %15 = vst [vmem:[#allocation2] sm:$0x1] %v14_v0 }
   0x3 LB: > { %s33_s8 = sadd.s32 1, %s5057_s12  ;;  %p4300_p0 = scmp.ge.s32.totalorder %s5061_s13, 1  ;;  %s5061_s13 = sphi %s5123_s13, %s21_s13   ;;  %s5057_s12 = sphi %s5121_s12, %s6491_s12   ;;  %s5053_s11 = sphi %s5119_s11, %s6490_s11  }
   0x4   : > { %p35_p1 = scmp.ge.s32.totalorder %s33_s8, 2  ;;  %p309_p2 = scmp.lt.s32.totalorder %s5061_s13, 3 }
   0x6   : > { %s6493_s8 = smov (%p35_p1, %s33_s8), 0  ;;  %p310_p3 = pnand %p4300_p0, %p309_p2 }
   0x8   : > { %313 = sbr.rel (%p310_p3) target bundleno = 1463 (0x5b7), region = 56 }
   0xf   : > { %v371_v1 = vld [vmem:[%s6431_s1] sm:$0xff]  ;;  %v5063_v3 = vmov 0   ;;  %v372_v4 = vld [vmem:[%s6431_s1 + $0x8] sm:$0xff]  ;;  %v374_v6 = vld [vmem:[%s6431_s1 + $0x18] sm:$0xff]  ;;  %v5064_v7 = vmov 1   ;;  %v6441_v11 = vmov 0.0   ;;  %v6440_v12 = vlaneseq }
  0x10   : > { %v367_v2 = vld [vmem:[%s6432_s2] sm:$0xff]  ;;  %4742 = vset.pattern.permute.xlu1 %v5063_v3  ;;  %4741 = vset.pattern.permute.xlu0 %v5063_v3  ;;  %v368_v5 = vld [vmem:[%s6432_s2 + $0x8] sm:$0xff]  ;;  %v373_v8 = vld [vmem:[%s6431_s1 + $0x10] sm:$0xff]  ;;  %p351_p4 = scmp.lt.s32.totalorder %s5053_s11, 1  ;;  %vm950_vm0 = vcmask 261120   ;;  %vm3522_vm1 = vcmask 1040384  }
  0x11   : > { %380 = vperm.xlu0 %4741, %v371_v1   ;;  %546 = vperm.xlu1 %4742, %v367_v2   ;;  %v369_v9 = vld [vmem:[%s6432_s2 + $0x10] sm:$0xff]  ;;  %v370_v10 = vld [vmem:[%s6432_s2 + $0x18] sm:$0xff]  ;;  %v926_v13 = vld [vmem:[%s6434_s4] sm:$0xff]  ;;  %v401_v15 = vshrl.u32 %v6440_v12, 7  ;;  %vm4214_vm4 = vcmask 254976  }
  0x12   : > { %1027 = vmatprep.mubr.f32.mxu0 %v6441_v11  ;;  %1116 = vmatprep.mubr.f32.mxu1 %v6441_v11  ;;  %s6495_s11 = smov (!%p351_p4, %s5053_s11), 1  ;;  %v927_v14 = vld [vmem:[%s6434_s4 + $0x8] sm:$0xff]  ;;  %v928_v16 = vld [vmem:[%s6434_s4 + $0x10] sm:$0xff]  ;;  %v1743_v17 = vld [vmem:[%s6436_s6] sm:$0xff] }
  0x13   : > { %s4445_s30 = sshll.u32 %s6495_s11, 5  ;;  %v406_v18 = vsub.s32 1, %v401_v15  ;;  %v414_v19 = vsub.s32 3, %v401_v15  ;;  %v5188_v20 = vsub.s32 0, %v401_v15  ;;  %v410_v22 = vsub.s32 2, %v401_v15  ;;  %v929_v24 = vld [vmem:[%s6434_s4 + $0x18] sm:$0xff] }
  0x14   : > { %s5186_s23 = scalar_lea.vmem %s6430_s0, %s4445_s30  ;;  %v422_v23 = vsub.s32 5, %v401_v15  ;;  %v1745_v25 = vld [vmem:[%s6436_s6 + $0x10] sm:$0xff]  ;;  %v430_v27 = vsub.s32 7, %v401_v15  ;;  %v418_v28 = vsub.s32 4, %v401_v15  ;;  %v426_v29 = vsub.s32 6, %v401_v15  ;;  %v1744_v35 = vld [vmem:[%s6436_s6 + $0x8] sm:$0xff] }
  0x15   : > { %385 = vperm.xlu0 %4741, %v372_v4   ;;  %551 = vperm.xlu1 %4742, %v368_v5   ;;  %6458 = vst [vmem:[#allocation3_spill] sm:$0xff] %v5188_v20  ;;  %v375_v21 = vld [vmem:[%s5186_s23] ss:$2 sm:$0xff]  ;;  %v4305_v26 = vld [vmem:[%s5186_s23 + $0x1] ss:$2 sm:$0xff]  ;;  %v1746_v54 = vld [vmem:[%s6436_s6 + $0x18] sm:$0xff] }
  0x16   : > { %v5198_v30 = vrot.slane %v375_v21, %v406_v18  ;;  %v5200_v31 = vrot.slane %v375_v21, %v414_v19  ;;  %v5203_v32 = vrot.slane %v375_v21, %v5188_v20  ;;  %v5205_v33 = vrot.slane %v375_v21, %v410_v22  ;;  %v2876_v36 = vld [vmem:[#allocation2] sm:$0x1]  ;;  %v4304_v41 = vld [vmem:[%s5186_s23 + $0x10] ss:$2 sm:$0xff]  ;;  %v4306_v46 = vld [vmem:[%s5186_s23 + $0x11] ss:$2 sm:$0xff] }
  0x17   : > { %v5207_v34 = vrot.slane %v375_v21, %v422_v23  ;;  %v5212_v37 = vrot.slane %v4305_v26, %v406_v18  ;;  %v5214_v38 = vrot.slane %v4305_v26, %v414_v19  ;;  %v5217_v39 = vrot.slane %v4305_v26, %v5188_v20  ;;  %s4303_s14 = sshll.u32 %s6495_s11, 1 }
  0x18   : > { %v5219_v40 = vrot.slane %v4305_v26, %v410_v22  ;;  %v5222_v42 = vrot.slane %v4305_v26, %v422_v23  ;;  %v5224_v43 = vrot.slane %v375_v21, %v430_v27  ;;  %v5226_v44 = vrot.slane %v375_v21, %v418_v28  ;;  %s366_s17 = scalar_lea.vmem %s6439_s9, %s4303_s14 }
  0x19   : > { %395 = vperm.xlu0 %4741, %v374_v6   ;;  %4743 = vset.pattern.permute.xlu1 %v5064_v7  ;;  %v5228_v45 = vrot.slane %v375_v21, %v426_v29  ;;  %v5231_v47 = vrot.slane %v4305_v26, %v430_v27  ;;  %v5233_v48 = vrot.slane %v4305_v26, %v418_v28 }
  0x1a   : > { %637 = vperm.xlu1 %4743, %v372_v4   ;;  %v5235_v49 = vrot.slane %v4305_v26, %v426_v29  ;;  %v5237_v50 = vrot.slane %v4304_v41, %v406_v18  ;;  %v5239_v51 = vrot.slane %v4304_v41, %v414_v19  ;;  %v5242_v52 = vrot.slane %v4304_v41, %v5188_v20 }
  0x1b   : > { %v5244_v53 = vrot.slane %v4304_v41, %v410_v22  ;;  %v5249_v55 = vrot.slane %v4306_v46, %v406_v18  ;;  %v5251_v56 = vrot.slane %v4306_v46, %v414_v19  ;;  %v5254_v57 = vrot.slane %v4306_v46, %v5188_v20 }
  0x1c   : > { %6459 = vst [vmem:[#allocation4_spill] sm:$0xff] %v5239_v51  ;;  %6460 = vst [vmem:[#allocation5_spill] sm:$0xff] %v5242_v52  ;;  %v5256_v58 = vrot.slane %v4304_v41, %v422_v23  ;;  %v5258_v59 = vrot.slane %v4306_v46, %v410_v22  ;;  %v5260_v60 = vrot.slane %v4304_v41, %v430_v27 }
  0x1d   : > { %4745 = vset.pattern.permute.xlu0 %v5064_v7  ;;  %6461 = vst [vmem:[#allocation6_spill] sm:$0xff] %v5244_v53  ;;  %6462 = vst [vmem:[#allocation7_spill] sm:$0xff] %v5251_v56  ;;  %v5262_v61 = vrot.slane %v4304_v41, %v418_v28  ;;  %v5264_v62 = vrot.slane %v4304_v41, %v426_v29  ;;  %v5272_v2 = vrot.slane %v4306_v46, %v430_v27 }
  0x1e   : > { %633 = vperm.xlu0 %4745, %v371_v1   ;;  %4744 = vset.pattern.permute.xlu1 %v5063_v3  ;;  %6463 = vst [vmem:[#allocation8_spill] sm:$0xff] %v5254_v57  ;;  %6464 = vst [vmem:[#allocation9_spill] sm:$0xff] %v5256_v58  ;;  %v5270_v1 = vrot.slane %v4306_v46, %v422_v23  ;;  %v5276_v4 = vrot.slane %v4306_v46, %v426_v29 }
  0x1f   : > { %390 = vperm.xlu1 %4744, %v373_v8   ;;  %6465 = vst [vmem:[#allocation10_spill] sm:$0xff] %v5258_v59  ;;  %6466 = vst [vmem:[#allocation11_spill] sm:$0xff] %v5260_v60 }
  0x20   : > { %6467 = vst [vmem:[#allocation12_spill] sm:$0xff] %v5262_v61  ;;  %6468 = vst [vmem:[#allocation13_spill] sm:$0xff] %v5264_v62 }
  0x21   : > { %6469 = vst [vmem:[#allocation14_spill] sm:$0xff] %v5270_v1  ;;  %6470 = vst [vmem:[#allocation15_spill] sm:$0xff] %v5272_v2 }
  0x22   : > { %641 = vperm.xlu0 %4745, %v373_v8   ;;  %6472 = vst [vmem:[#allocation17_spill] sm:$0xff] %v5276_v4 }
  0x23   : > { %556 = vperm.xlu1 %4744, %v369_v9  }
  0x26   : > { %4748 = vset.pattern.permute.xlu0 %v5063_v3 }
  0x27   : > { %561 = vperm.xlu1 %4744, %v370_v10   ;;  %937 = vperm.xlu0 %4748, %v927_v14  }
  0x2b   : > { %4746 = vset.pattern.permute.xlu1 %v5064_v7  ;;  %1749 = vperm.xlu0 %4748, %v1743_v17  }
  0x2c   : > { %645 = vperm.xlu1 %4746, %v374_v6  }
  0x2f   : > { %1759 = vperm.xlu0 %4748, %v1745_v25  }
  0x30   : > { %4747 = vset.pattern.permute.xlu1 %v5063_v3  ;;  %v5274_v3 = vrot.slane %v4306_v46, %v418_v28 }
  0x31   : > { %932 = vperm.xlu1 %4747, %v926_v13  }
  0x32   : > { %6471 = vst [vmem:[#allocation16_spill] sm:$0xff] %v5274_v3 }
  0x33   : > { %2879 = vperm.xlu0 %4748, %v2876_v36  }
  0x35   : > { %942 = vperm.xlu1 %4747, %v928_v16  }
  0x39   : > { %947 = vperm.xlu1 %4747, %v929_v24  }
  0x3d   : > { %1754 = vperm.xlu1 %4747, %v1744_v35  }
  0x41   : > { %1764 = vperm.xlu1 %4747, %v1746_v54  }
  0x90   : > { %v5266_v63 = vpop.permute.xlu0 %380  ;;  %v5268_v0 = vpop.permute.xlu1 %546 }
  0x91   : > { %v481_v5 = vmul.f32 %v5198_v30, %v5266_v63  ;;  %v483_v6 = vmul.f32 %v5200_v31, %v5266_v63  ;;  %v480_v7 = vmul.f32 %v5203_v32, %v5266_v63  ;;  %v482_v8 = vmul.f32 %v5205_v33, %v5266_v63 }
  0x92   : > { %v485_v9 = vmul.f32 %v5207_v34, %v5266_v63  ;;  %v487_v10 = vmul.f32 %v5224_v43, %v5266_v63  ;;  %v484_v13 = vmul.f32 %v5226_v44, %v5266_v63  ;;  %v486_v14 = vmul.f32 %v5228_v45, %v5266_v63 }
  0x93   : > { %v565_v15 = vadd.f32 %v5268_v0, %v481_v5  ;;  %v567_v16 = vadd.f32 %v5268_v0, %v483_v6  ;;  %v564_v17 = vadd.f32 %v5268_v0, %v480_v7  ;;  %v566_v18 = vadd.f32 %v5268_v0, %v482_v8 }
  0x94   : > { %v5298_v19 = vpop.permute.xlu0 %385  ;;  %v5300_v21 = vpop.permute.xlu1 %551  ;;  %v5303_v22 = vadd.f32 %v5268_v0, %v485_v9  ;;  %v5306_v23 = vadd.f32 %v5268_v0, %v487_v10  ;;  %v5309_v24 = vadd.f32 %v5268_v0, %v484_v13  ;;  %v5312_v25 = vadd.f32 %v5268_v0, %v486_v14 }
  0x95   : > { %v497_v26 = vmul.f32 %v5198_v30, %v5298_v19  ;;  %v499_v27 = vmul.f32 %v5200_v31, %v5298_v19  ;;  %v496_v28 = vmul.f32 %v5203_v32, %v5298_v19  ;;  %v498_v29 = vmul.f32 %v5205_v33, %v5298_v19 }
  0x96   : > { %v501_v35 = vmul.f32 %v5207_v34, %v5298_v19  ;;  %v503_v36 = vmul.f32 %v5224_v43, %v5298_v19  ;;  %v500_v41 = vmul.f32 %v5226_v44, %v5298_v19  ;;  %v502_v46 = vmul.f32 %v5228_v45, %v5298_v19 }
  0x97   : > { %v581_v54 = vadd.f32 %v5300_v21, %v497_v26  ;;  %v583_v5 = vadd.f32 %v5300_v21, %v499_v27  ;;  %v580_v6 = vadd.f32 %v5300_v21, %v496_v28  ;;  %v582_v7 = vadd.f32 %v5300_v21, %v498_v29 }
  0x98   : > { %v5334_v8 = vpop.permute.xlu0 %395  ;;  %v585_v9 = vadd.f32 %v5300_v21, %v501_v35  ;;  %v587_v10 = vadd.f32 %v5300_v21, %v503_v36  ;;  %v584_v13 = vadd.f32 %v5300_v21, %v500_v41  ;;  %v586_v14 = vadd.f32 %v5300_v21, %v502_v46 }
  0x99   : > { %v5340_v12 = vpop.permute.xlu1 %637  ;;  %v5344_v26 = vmul.f32 %v5198_v30, %v5334_v8  ;;  %v5348_v27 = vmul.f32 %v5200_v31, %v5334_v8  ;;  %v5352_v28 = vmul.f32 %v5203_v32, %v5334_v8  ;;  %v5356_v29 = vmul.f32 %v5205_v33, %v5334_v8 }
  0x9a   : > { %v747_v35 = vmul.f32 %v5212_v37, %v5340_v12  ;;  %v749_v36 = vmul.f32 %v5214_v38, %v5340_v12  ;;  %v746_v41 = vmul.f32 %v5217_v39, %v5340_v12  ;;  %v748_v46 = vmul.f32 %v5219_v40, %v5340_v12 }
  0x9b   : > { %v751_v11 = vmul.f32 %v5222_v42, %v5340_v12  ;;  %v753_v20 = vmul.f32 %v5231_v47, %v5340_v12  ;;  %v750_v4 = vmul.f32 %v5233_v48, %v5340_v12  ;;  %v752_v62 = vmul.f32 %v5235_v49, %v5340_v12 }
  0x9c   : > { %v811_v3 = vadd.f32 %v747_v35, %v581_v54  ;;  %v813_v61 = vadd.f32 %v749_v36, %v583_v5  ;;  %v810_v2 = vadd.f32 %v746_v41, %v580_v6  ;;  %v812_v60 = vadd.f32 %v748_v46, %v582_v7 }
  0x9d   : > { %v5374_v1 = vpop.permute.xlu0 %633  ;;  %v5376_v58 = vadd.f32 %v751_v11, %v585_v9  ;;  %v5378_v59 = vadd.f32 %v753_v20, %v587_v10  ;;  %v5380_v53 = vadd.f32 %v750_v4, %v584_v13  ;;  %v5382_v57 = vadd.f32 %v752_v62, %v586_v14 }
  0x9e   : > { %v5384_v52 = vpop.permute.xlu1 %390  ;;  %v731_v56 = vmul.f32 %v5212_v37, %v5374_v1  ;;  %v875_v51 = vmax.f32 %v811_v3, 0.0  ;;  %v733_v54 = vmul.f32 %v5214_v38, %v5374_v1  ;;  %v877_v5 = vmax.f32 %v813_v61, 0.0 }
  0x9f   : > { %v730_v11 = vmul.f32 %v5217_v39, %v5374_v1  ;;  %v874_v6 = vmax.f32 %v810_v2, 0.0  ;;  %v732_v20 = vmul.f32 %v5219_v40, %v5374_v1  ;;  %v876_v4 = vmax.f32 %v812_v60, 0.0 }
  0xa0   : > { %v795_v62 = vadd.f32 %v731_v56, %v565_v15  ;;  %v797_v7 = vadd.f32 %v733_v54, %v567_v16  ;;  %v513_v9 = vmul.f32 %v5198_v30, %v5384_v52  ;;  %v515_v3 = vmul.f32 %v5200_v31, %v5384_v52 }
  0xa1   : > { %v5398_v10 = vpop.permute.xlu0 %641  ;;  %v794_v13 = vadd.f32 %v730_v11, %v564_v17  ;;  %v796_v61 = vadd.f32 %v732_v20, %v566_v18  ;;  %v512_v14 = vmul.f32 %v5203_v32, %v5384_v52  ;;  %v514_v2 = vmul.f32 %v5205_v33, %v5384_v52 }
  0xa2   : > { %v5404_v35 = vpop.permute.xlu1 %556  ;;  %v859_v56 = vmax.f32 %v795_v62, 0.0  ;;  %v861_v60 = vmax.f32 %v797_v7, 0.0  ;;  %v763_v30 = vmul.f32 %v5212_v37, %v5398_v10  ;;  %v765_v31 = vmul.f32 %v5214_v38, %v5398_v10 }
  0xa3   : > { %v858_v15 = vmax.f32 %v794_v13, 0.0  ;;  %v860_v16 = vmax.f32 %v796_v61, 0.0  ;;  %v597_v17 = vadd.f32 %v5404_v35, %v513_v9  ;;  %v599_v18 = vadd.f32 %v5404_v35, %v515_v3 }
  0xa4   : > { %v4446_v32 = vpack.c.bf16 %v875_v51, %v859_v56  ;;  %v4454_v36 = vpack.c.bf16 %v877_v5, %v861_v60  ;;  %v596_v33 = vadd.f32 %v5404_v35, %v512_v14  ;;  %v762_v41 = vmul.f32 %v5217_v39, %v5398_v10 }
  0xa5   : > { %v4448_v46 = vpack.c.bf16 %v874_v6, %v858_v15  ;;  %v4456_v54 = vpack.c.bf16 %v876_v4, %v860_v16  ;;  %v827_v11 = vadd.f32 %v763_v30, %v597_v17  ;;  %v829_v20 = vadd.f32 %v765_v31, %v599_v18 }
  0xa6   : > { %v5415_v62 = vpop.permute.xlu1 %561  ;;  %4447 = vmatprep.subr.bf16.mxu0 %v4446_v32  ;;  %4455 = vmatprep.subr.bf16.mxu1 %v4454_v36  ;;  %v826_v7 = vadd.f32 %v762_v41, %v596_v33  ;;  %v598_v9 = vadd.f32 %v5404_v35, %v514_v2  ;;  %v764_v51 = vmul.f32 %v5219_v40, %v5398_v10  ;;  %v879_v5 = vmax.f32 %v5376_v58, 0.0 }
  0xa7   : > { %4449 = vmatpush1.bf16.msra.mxu0 %v4448_v46  ;;  %4457 = vmatpush1.bf16.msra.mxu1 %v4456_v54  ;;  %v613_v6 = vadd.f32 %v5415_v62, %v5344_v26  ;;  %v891_v4 = vmax.f32 %v827_v11, 0.0  ;;  %v615_v3 = vadd.f32 %v5415_v62, %v5348_v27  ;;  %v893_v13 = vmax.f32 %v829_v20, 0.0 }
  0xa8   : > { %v612_v61 = vadd.f32 %v5415_v62, %v5352_v28  ;;  %v890_v14 = vmax.f32 %v826_v7, 0.0  ;;  %v614_v2 = vadd.f32 %v5415_v62, %v5356_v29  ;;  %v828_v56 = vadd.f32 %v764_v51, %v598_v9 }
  0xa9   : > { %v735_v58 = vmul.f32 %v5222_v42, %v5374_v1  ;;  %v737_v60 = vmul.f32 %v5231_v47, %v5374_v1  ;;  %v881_v26 = vmax.f32 %v5378_v59, 0.0  ;;  %v734_v27 = vmul.f32 %v5233_v48, %v5374_v1 }
  0xaa   : > { %v892_v30 = vmax.f32 %v828_v56, 0.0  ;;  %v878_v31 = vmax.f32 %v5380_v53, 0.0  ;;  %v736_v28 = vmul.f32 %v5235_v49, %v5374_v1  ;;  %v880_v29 = vmax.f32 %v5382_v57, 0.0 }
  0xab   : > { %v5440_v15 = vpop.permute.xlu1 %645  ;;  %v799_v16 = vadd.f32 %v735_v58, %v5303_v22  ;;  %v801_v17 = vadd.f32 %v737_v60, %v5306_v23  ;;  %v798_v18 = vadd.f32 %v734_v27, %v5309_v24  ;;  %v517_v59 = vmul.f32 %v5207_v34, %v5384_v52 }
  0xac   : > { %v779_v32 = vmul.f32 %v5212_v37, %v5440_v15  ;;  %v781_v53 = vmul.f32 %v5214_v38, %v5440_v15  ;;  %v778_v57 = vmul.f32 %v5217_v39, %v5440_v15  ;;  %v780_v36 = vmul.f32 %v5219_v40, %v5440_v15 }
  0xad   : > { %v863_v22 = vmax.f32 %v799_v16, 0.0  ;;  %v865_v33 = vmax.f32 %v801_v17, 0.0  ;;  %v862_v23 = vmax.f32 %v798_v18, 0.0  ;;  %v800_v24 = vadd.f32 %v736_v28, %v5312_v25 }
  0xae   : > { %v843_v41 = vadd.f32 %v779_v32, %v613_v6  ;;  %v845_v46 = vadd.f32 %v781_v53, %v615_v3  ;;  %v842_v54 = vadd.f32 %v778_v57, %v612_v61  ;;  %v844_v11 = vadd.f32 %v780_v36, %v614_v2 }
  0xaf   : > { %v4462_v20 = vpack.c.bf16 %v879_v5, %v863_v22  ;;  %v4470_v37 = vpack.c.bf16 %v881_v26, %v865_v33  ;;  %v4464_v7 = vpack.c.bf16 %v878_v31, %v862_v23  ;;  %v864_v9 = vmax.f32 %v800_v24, 0.0 }
  0xb0   : > { %v907_v38 = vmax.f32 %v843_v41, 0.0  ;;  %v909_v51 = vmax.f32 %v845_v46, 0.0  ;;  %v906_v56 = vmax.f32 %v842_v54, 0.0  ;;  %v908_v39 = vmax.f32 %v844_v11, 0.0 }
  0xb1   : > { %v4472_v58 = vpack.c.bf16 %v880_v29, %v864_v9  ;;  %v533_v40 = vmul.f32 %v5207_v34, %v5334_v8  ;;  %v601_v60 = vadd.f32 %v5404_v35, %v517_v59  ;;  %v767_v25 = vmul.f32 %v5222_v42, %v5398_v10 }
  0xb2   : > { %v4450_v6 = vpack.c.bf16 %v907_v38, %v891_v4  ;;  %v4458_v3 = vpack.c.bf16 %v909_v51, %v893_v13  ;;  %v4452_v61 = vpack.c.bf16 %v906_v56, %v890_v14  ;;  %v4460_v5 = vpack.c.bf16 %v908_v39, %v892_v30 }
  0xb3   : > { %v617_v2 = vadd.f32 %v5415_v62, %v533_v40  ;;  %v783_v26 = vmul.f32 %v5222_v42, %v5440_v15  ;;  %v831_v27 = vadd.f32 %v767_v25, %v601_v60  ;;  %v519_v31 = vmul.f32 %v5224_v43, %v5384_v52  ;;  %v5475_v42 = vld [vmem:[%s6433_s3] sm:$0xff]  ;;  %v5527_v60 = vld [vmem:[%s6433_s3 + $0x10] sm:$0xff] }
  0xb4   : > { %4451 = vmatprep.subr.bf16.mxu0 %v4450_v6  ;;  %4459 = vmatprep.subr.bf16.mxu1 %v4458_v3  ;;  %v535_v34 = vmul.f32 %v5224_v43, %v5334_v8  ;;  %v769_v4 = vmul.f32 %v5231_v47, %v5398_v10  ;;  %v785_v13 = vmul.f32 %v5231_v47, %v5440_v15  ;;  %v6473_v41 = vmov 0.0  }
  0xb5   : > { %4453 = vmatpush1.bf16.msra.mxu0 %v4452_v61  ;;  %4461 = vmatpush1.bf16.msra.mxu1 %v4460_v5  ;;  %v847_v14 = vadd.f32 %v783_v26, %v617_v2  ;;  %v603_v30 = vadd.f32 %v5404_v35, %v519_v31  ;;  %v516_v43 = vmul.f32 %v5226_v44, %v5384_v52  ;;  %v895_v28 = vmax.f32 %v831_v27, 0.0  ;;  %v6474_v61 = vld [vmem:[#allocation4_spill] sm:$0xff]  ;;  %v6475_v31 = vld [vmem:[#allocation7_spill] sm:$0xff] }
  0xb6   : > { %4463 = vmatprep.subr.bf16.mxu0 %v4462_v20  ;;  %4471 = vmatprep.subr.bf16.mxu1 %v4470_v37  ;;  %v619_v29 = vadd.f32 %v5415_v62, %v535_v34  ;;  %v532_v47 = vmul.f32 %v5226_v44, %v5334_v8  ;;  %v766_v16 = vmul.f32 %v5233_v48, %v5398_v10 }
  0xb7   : > { %v911_v17 = vmax.f32 %v847_v14, 0.0  ;;  %v833_v18 = vadd.f32 %v769_v4, %v603_v30  ;;  %v600_v59 = vadd.f32 %v5404_v35, %v516_v43  ;;  %v782_v32 = vmul.f32 %v5233_v48, %v5440_v15  ;;  %v5498_v48 = vld [vmem:[%s6433_s3 + $0x8] sm:$0xff] }
  0xb8   : > { %4307 = vmatmul.mubr.msk.f32.vlgmr.msra.gmra.mrb[0].mxu0 %vm950_vm0, %v5475_v42  ;;  %4311 = vmatmul.mubr.msk.f32.vlgmr.msra.gmra.mrb[0].mxu1 %vm950_vm0, %v5475_v42  ;;  %v849_v53 = vadd.f32 %v785_v13, %v619_v29  ;;  %v616_v57 = vadd.f32 %v5415_v62, %v532_v47  ;;  %v518_v44 = vmul.f32 %v5228_v45, %v5384_v52  ;;  %v5549_v29 = vld [vmem:[%s6433_s3 + $0x18] sm:$0xff] }
  0xb9   : > { %4465 = vmatpush1.bf16.msra.mxu0 %v4464_v7  ;;  %4473 = vmatpush1.bf16.msra.mxu1 %v4472_v58  ;;  %v4466_v36 = vpack.c.bf16 %v911_v17, %v895_v28  ;;  %v897_v22 = vmax.f32 %v833_v18, 0.0  ;;  %v830_v33 = vadd.f32 %v766_v16, %v600_v59  ;;  %v534_v23 = vmul.f32 %v5228_v45, %v5334_v8  ;;  %v6476_v47 = vld [vmem:[#allocation5_spill] sm:$0xff] }
  0xba   : > { %v913_v24 = vmax.f32 %v849_v53, 0.0  ;;  %1033 = vmatprep.mubr.f32.mxu0 %v6473_v41  ;;  %1122 = vmatprep.mubr.f32.mxu1 %v6473_v41  ;;  %v846_v46 = vadd.f32 %v782_v32, %v616_v57  ;;  %v602_v54 = vadd.f32 %v5404_v35, %v518_v44  ;;  %v768_v11 = vmul.f32 %v5235_v49, %v5398_v10  ;;  %v6477_v32 = vld [vmem:[#allocation8_spill] sm:$0xff] }
  0xbb   : > { %4467 = vmatprep.subr.bf16.mxu0 %v4466_v36  ;;  %v894_v20 = vmax.f32 %v830_v33, 0.0  ;;  %v618_v37 = vadd.f32 %v5415_v62, %v534_v23  ;;  %v784_v7 = vmul.f32 %v5235_v49, %v5440_v15  ;;  %v489_v45 = vmul.f32 %v5237_v50, %v5266_v63 }
  0xbc   : > { %v4474_v9 = vpack.c.bf16 %v913_v24, %v897_v22  ;;  %4308 = vmatmul.mubr.msk.f32.gmra.mrb[2].mxu0 %vm950_vm0, %v5498_v48  ;;  %4312 = vmatmul.mubr.msk.f32.gmra.mrb[2].mxu1 %vm950_vm0, %v5498_v48  ;;  %v910_v38 = vmax.f32 %v846_v46, 0.0  ;;  %v832_v51 = vadd.f32 %v768_v11, %v602_v54  ;;  %v505_v56 = vmul.f32 %v5237_v50, %v5298_v19  ;;  %v6478_v22 = vld [vmem:[#allocation6_spill] sm:$0xff] }
  0xbd   : > { %v848_v39 = vadd.f32 %v784_v7, %v618_v37  ;;  %v573_v58 = vadd.f32 %v5268_v0, %v489_v45  ;;  %v739_v49 = vmul.f32 %v5249_v55, %v5374_v1  ;;  %v755_v40 = vmul.f32 %v5249_v55, %v5340_v12  ;;  %1039 = vmatprep.mubr.f32.mxu0 %v6473_v41  ;;  %v6479_v7 = vld [vmem:[#allocation10_spill] sm:$0xff] }
  0xbe   : > { %4475 = vmatprep.subr.bf16.mxu1 %v4474_v9  ;;  %v4468_v25 = vpack.c.bf16 %v910_v38, %v894_v20  ;;  %v896_v6 = vmax.f32 %v832_v51, 0.0  ;;  %v589_v3 = vadd.f32 %v5300_v21, %v505_v56  ;;  %v491_v5 = vmul.f32 %v6474_v61, %v5266_v63  ;;  %1128 = vmatprep.mubr.f32.mxu1 %v6473_v41 }
  0xbf   : > { %v912_v2 = vmax.f32 %v848_v39, 0.0  ;;  %v803_v26 = vadd.f32 %v739_v49, %v573_v58  ;;  %v507_v27 = vmul.f32 %v6474_v61, %v5298_v19  ;;  %v741_v34 = vmul.f32 %v6475_v31, %v5374_v1 }
  0xc0   : > { %4469 = vmatpush1.bf16.msra.mxu0 %v4468_v25  ;;  %v819_v4 = vadd.f32 %v755_v40, %v589_v3  ;;  %v575_v13 = vadd.f32 %v5268_v0, %v491_v5  ;;  %v757_v14 = vmul.f32 %v6475_v31, %v5340_v12  ;;  %4313 = vmatmul.mubr.msk.f32.gmra.mrb[4].mxu1 %vm950_vm0, %v5527_v60 }
  0xc1   : > { %v4476_v30 = vpack.c.bf16 %v912_v2, %v896_v6  ;;  %v867_v43 = vmax.f32 %v803_v26, 0.0  ;;  %v591_v28 = vadd.f32 %v5300_v21, %v507_v27  ;;  %4309 = vmatmul.mubr.msk.f32.gmra.mrb[4].mxu0 %vm950_vm0, %v5527_v60  ;;  %1134 = vmatprep.mubr.f32.mxu1 %v6473_v41  ;;  %v488_v16 = vmul.f32 %v6476_v47, %v5266_v63 }
  0xc2   : > { %v883_v17 = vmax.f32 %v819_v4, 0.0  ;;  %v805_v18 = vadd.f32 %v741_v34, %v575_v13  ;;  %1045 = vmatprep.mubr.f32.mxu0 %v6473_v41  ;;  %v504_v59 = vmul.f32 %v6476_v47, %v5298_v19  ;;  %v738_v53 = vmul.f32 %v6477_v32, %v5374_v1 }
  0xc3   : > { %4477 = vmatpush1.bf16.msra.mxu1 %v4476_v30  ;;  %v821_v57 = vadd.f32 %v757_v14, %v591_v28  ;;  %v572_v44 = vadd.f32 %v5268_v0, %v488_v16  ;;  %v754_v36 = vmul.f32 %v6477_v32, %v5340_v12  ;;  %v490_v33 = vmul.f32 %v6478_v22, %v5266_v63 }
  0xc4   : > { %v4478_v23 = vpack.c.bf16 %v883_v17, %v867_v43  ;;  %v869_v24 = vmax.f32 %v805_v18, 0.0  ;;  %4314 = vmatmul.mubr.msk.f32.gmra.mrb[6].mxu1 %vm950_vm0, %v5549_v29  ;;  %v588_v46 = vadd.f32 %v5300_v21, %v504_v59  ;;  %v506_v54 = vmul.f32 %v6478_v22, %v5298_v19 }
  0xc5   : > { %v885_v11 = vmax.f32 %v821_v57, 0.0  ;;  %4310 = vmatmul.mubr.msk.f32.gmra.mrb[6].mxu0 %vm950_vm0, %v5549_v29  ;;  %1294 = vmatprep.mubr.f32.mxu1 %v6473_v41  ;;  %v802_v20 = vadd.f32 %v738_v53, %v572_v44  ;;  %v574_v37 = vadd.f32 %v5268_v0, %v490_v33  ;;  %v740_v45 = vmul.f32 %v6479_v7, %v5374_v1 }
  0xc6   : > { %4479 = vmatprep.subr.bf16.mxu0 %v4478_v23  ;;  %1205 = vmatprep.mubr.f32.mxu0 %v6473_v41  ;;  %v818_v9 = vadd.f32 %v754_v36, %v588_v46  ;;  %v590_v38 = vadd.f32 %v5300_v21, %v506_v54  ;;  %v756_v51 = vmul.f32 %v6479_v7, %v5340_v12 }
  0xc7   : > { %v4486_v56 = vpack.c.bf16 %v885_v11, %v869_v24  ;;  %v866_v39 = vmax.f32 %v802_v20, 0.0  ;;  %v804_v58 = vadd.f32 %v740_v45, %v574_v37  ;;  %v521_v49 = vmul.f32 %v5237_v50, %v5384_v52 }
  0xc8   : > { %4319 = vmatmul.mubr.msk.f32.vlgmr.msra.gmra.mrb[8].mxu1 %vm950_vm0, %v5475_v42  ;;  %v882_v40 = vmax.f32 %v818_v9, 0.0  ;;  %v820_v25 = vadd.f32 %v756_v51, %v590_v38  ;;  %v537_v6 = vmul.f32 %v5237_v50, %v5334_v8  ;;  %v771_v3 = vmul.f32 %v5249_v55, %v5398_v10  ;;  %v6480_v51 = vld [vmem:[#allocation9_spill] sm:$0xff] }
  0xc9   : > { %4487 = vmatprep.subr.bf16.mxu1 %v4486_v56  ;;  %4315 = vmatmul.mubr.msk.f32.vlgmr.msra.gmra.mrb[8].mxu0 %vm950_vm0, %v5475_v42  ;;  %v868_v5 = vmax.f32 %v804_v58, 0.0  ;;  %v605_v2 = vadd.f32 %v5404_v35, %v521_v49  ;;  %v787_v26 = vmul.f32 %v5249_v55, %v5440_v15  ;;  %v523_v27 = vmul.f32 %v6474_v61, %v5384_v52 }
  0xca   : > { %v4480_v34 = vpack.c.bf16 %v882_v40, %v866_v39  ;;  %v884_v4 = vmax.f32 %v820_v25, 0.0  ;;  %v621_v50 = vadd.f32 %v5415_v62, %v537_v6  ;;  %v539_v13 = vmul.f32 %v6474_v61, %v5334_v8  ;;  %1211 = vmatprep.mubr.f32.mxu0 %v6473_v41  ;;  %1300 = vmatprep.mubr.f32.mxu1 %v6473_v41  ;;  %v6481_v25 = vld [vmem:[#allocation14_spill] sm:$0xff] }
  0xcb   : > { %v835_v14 = vadd.f32 %v771_v3, %v605_v2  ;;  %v607_v30 = vadd.f32 %v5404_v35, %v523_v27  ;;  %v773_v55 = vmul.f32 %v6475_v31, %v5398_v10  ;;  %v789_v43 = vmul.f32 %v6475_v31, %v5440_v15 }
  0xcc   : > { %4481 = vmatpush1.bf16.msra.mxu0 %v4480_v34  ;;  %v4488_v28 = vpack.c.bf16 %v884_v4, %v868_v5  ;;  %v851_v16 = vadd.f32 %v787_v26, %v621_v50  ;;  %v623_v17 = vadd.f32 %v5415_v62, %v539_v13  ;;  %4320 = vmatmul.mubr.msk.f32.gmra.mrb[10].mxu1 %vm950_vm0, %v5498_v48  ;;  %v6482_v34 = vld [vmem:[#allocation11_spill] sm:$0xff] }
  0xcd   : > { %v899_v61 = vmax.f32 %v835_v14, 0.0  ;;  %v837_v18 = vadd.f32 %v773_v55, %v607_v30  ;;  %4316 = vmatmul.mubr.msk.f32.gmra.mrb[10].mxu0 %vm950_vm0, %v5498_v48  ;;  %v520_v59 = vmul.f32 %v6476_v47, %v5384_v52  ;;  %v536_v53 = vmul.f32 %v6476_v47, %v5334_v8  ;;  %1306 = vmatprep.mubr.f32.mxu1 %v6473_v41  ;;  %v6483_v55 = vld [vmem:[#allocation15_spill] sm:$0xff] }
  0xce   : > { %4489 = vmatpush1.bf16.msra.mxu1 %v4488_v28  ;;  %v915_v31 = vmax.f32 %v851_v16, 0.0  ;;  %v853_v57 = vadd.f32 %v789_v43, %v623_v17  ;;  %v770_v44 = vmul.f32 %v6477_v32, %v5398_v10  ;;  %v786_v36 = vmul.f32 %v6477_v32, %v5440_v15  ;;  %1217 = vmatprep.mubr.f32.mxu0 %v6473_v41 }
  0xcf   : > { %v901_v33 = vmax.f32 %v837_v18, 0.0  ;;  %v604_v23 = vadd.f32 %v5404_v35, %v520_v59  ;;  %v620_v24 = vadd.f32 %v5415_v62, %v536_v53  ;;  %v522_v47 = vmul.f32 %v6478_v22, %v5384_v52 }
  0xd0   : > { %v4482_v46 = vpack.c.bf16 %v915_v31, %v899_v61  ;;  %v917_v54 = vmax.f32 %v853_v57, 0.0  ;;  %v538_v11 = vmul.f32 %v6478_v22, %v5334_v8  ;;  %v772_v20 = vmul.f32 %v6479_v7, %v5398_v10  ;;  %4321 = vmatmul.mubr.msk.f32.gmra.mrb[12].mxu1 %vm950_vm0, %v5527_v60  ;;  %v6484_v61 = vld [vmem:[#allocation12_spill] sm:$0xff] }
  0xd1   : > { %v834_v32 = vadd.f32 %v770_v44, %v604_v23  ;;  %v850_v37 = vadd.f32 %v786_v36, %v620_v24  ;;  %v606_v45 = vadd.f32 %v5404_v35, %v522_v47  ;;  %v788_v9 = vmul.f32 %v6479_v7, %v5440_v15  ;;  %4317 = vmatmul.mubr.msk.f32.gmra.mrb[12].mxu0 %vm950_vm0, %v5527_v60  ;;  %v6485_v23 = vld [vmem:[#allocation16_spill] sm:$0xff] }
  0xd2   : > { %4483 = vmatprep.subr.bf16.mxu0 %v4482_v46  ;;  %v4490_v38 = vpack.c.bf16 %v917_v54, %v901_v33  ;;  %v622_v22 = vadd.f32 %v5415_v62, %v538_v11  ;;  %v493_v56 = vmul.f32 %v6480_v51, %v5266_v63  ;;  %v509_v39 = vmul.f32 %v6480_v51, %v5298_v19 }
  0xd3   : > { %v898_v58 = vmax.f32 %v834_v32, 0.0  ;;  %v914_v49 = vmax.f32 %v850_v37, 0.0  ;;  %v836_v40 = vadd.f32 %v772_v20, %v606_v45  ;;  %v743_v6 = vmul.f32 %v6481_v25, %v5374_v1  ;;  %1223 = vmatprep.mubr.f32.mxu0 %v6473_v41  ;;  %1312 = vmatprep.mubr.f32.mxu1 %v6473_v41  ;;  %v6486_v37 = vld [vmem:[#allocation13_spill] sm:$0xff] }
  0xd4   : > { %4491 = vmatprep.subr.bf16.mxu1 %v4490_v38  ;;  %v852_v7 = vadd.f32 %v788_v9, %v622_v22  ;;  %v577_v3 = vadd.f32 %v5268_v0, %v493_v56  ;;  %v593_v5 = vadd.f32 %v5300_v21, %v509_v39  ;;  %v759_v2 = vmul.f32 %v6481_v25, %v5340_v12  ;;  %v6487_v22 = vld [vmem:[#allocation17_spill] sm:$0xff] }
  0xd5   : > { %v4484_v26 = vpack.c.bf16 %v914_v49, %v898_v58  ;;  %v900_v27 = vmax.f32 %v836_v40, 0.0  ;;  %v495_v4 = vmul.f32 %v6482_v34, %v5266_v63  ;;  %v511_v50 = vmul.f32 %v6482_v34, %v5298_v19  ;;  %4318 = vmatmul.mubr.msk.f32.gmra.mrb[14].mxu0 %vm950_vm0, %v5549_v29  ;;  %4322 = vmatmul.mubr.msk.f32.gmra.mrb[14].mxu1 %vm950_vm0, %v5549_v29 }
  0xd6   : > { %v916_v13 = vmax.f32 %v852_v7, 0.0  ;;  %v807_v14 = vadd.f32 %v743_v6, %v577_v3  ;;  %v823_v30 = vadd.f32 %v759_v2, %v593_v5  ;;  %v745_v43 = vmul.f32 %v6483_v55, %v5374_v1  ;;  %1383 = vmatprep.mubr.f32.mxu0 %v6473_v41  ;;  %1472 = vmatprep.mubr.f32.mxu1 %v6473_v41 }
  0xd7   : > { %4485 = vmatpush1.bf16.msra.mxu0 %v4484_v26  ;;  %v579_v28 = vadd.f32 %v5268_v0, %v495_v4  ;;  %v595_v16 = vadd.f32 %v5300_v21, %v511_v50  ;;  %v761_v17 = vmul.f32 %v6483_v55, %v5340_v12  ;;  %v492_v18 = vmul.f32 %v6484_v61, %v5266_v63 }
  0xd8   : > { %v4492_v59 = vpack.c.bf16 %v916_v13, %v900_v27  ;;  %v871_v53 = vmax.f32 %v807_v14, 0.0  ;;  %v887_v31 = vmax.f32 %v823_v30, 0.0  ;;  %v508_v57 = vmul.f32 %v6484_v61, %v5298_v19 }
  0xd9   : > { %v809_v44 = vadd.f32 %v745_v43, %v579_v28  ;;  %v825_v36 = vadd.f32 %v761_v17, %v595_v16  ;;  %v576_v33 = vadd.f32 %v5268_v0, %v492_v18  ;;  %v742_v24 = vmul.f32 %v6485_v23, %v5374_v1 }
  0xda   : > { %4493 = vmatpush1.bf16.msra.mxu1 %v4492_v59  ;;  %v4494_v47 = vpack.c.bf16 %v887_v31, %v871_v53  ;;  %4323 = vmatmul.mubr.msk.f32.vlgmr.msra.gmra.mrb[16].mxu0 %vm950_vm0, %v5475_v42  ;;  %v592_v46 = vadd.f32 %v5300_v21, %v508_v57  ;;  %v758_v54 = vmul.f32 %v6485_v23, %v5340_v12 }
  0xdb   : > { %v873_v11 = vmax.f32 %v809_v44, 0.0  ;;  %v889_v20 = vmax.f32 %v825_v36, 0.0  ;;  %v806_v32 = vadd.f32 %v742_v24, %v576_v33  ;;  %v494_v45 = vmul.f32 %v6486_v37, %v5266_v63  ;;  %1389 = vmatprep.mubr.f32.mxu0 %v6473_v41 }
  0xdc   : > { %4495 = vmatprep.subr.bf16.mxu0 %v4494_v47  ;;  %v822_v9 = vadd.f32 %v758_v54, %v592_v46  ;;  %v510_v38 = vmul.f32 %v6486_v37, %v5298_v19  ;;  %v744_v56 = vmul.f32 %v6487_v22, %v5374_v1  ;;  %v760_v39 = vmul.f32 %v6487_v22, %v5340_v12 }
  0xdd   : > { %v4502_v58 = vpack.c.bf16 %v889_v20, %v873_v11  ;;  %4327 = vmatmul.mubr.msk.f32.vlgmr.msra.gmra.mrb[16].mxu1 %vm950_vm0, %v5475_v42  ;;  %v870_v49 = vmax.f32 %v806_v32, 0.0  ;;  %v578_v63 = vadd.f32 %v5268_v0, %v494_v45  ;;  %v525_v40 = vmul.f32 %v6480_v51, %v5384_v52 }
  0xde   : > { %v886_v6 = vmax.f32 %v822_v9, 0.0  ;;  %v594_v7 = vadd.f32 %v5300_v21, %v510_v38  ;;  %v541_v19 = vmul.f32 %v6480_v51, %v5334_v8  ;;  %v775_v1 = vmul.f32 %v6481_v25, %v5398_v10  ;;  %1478 = vmatprep.mubr.f32.mxu1 %v6473_v41  ;;  %4324 = vmatmul.mubr.msk.f32.gmra.mrb[18].mxu0 %vm950_vm0, %v5498_v48 }
  0xdf   : > { %4503 = vmatprep.subr.bf16.mxu1 %v4502_v58  ;;  %v808_v12 = vadd.f32 %v744_v56, %v578_v63  ;;  %v609_v0 = vadd.f32 %v5404_v35, %v525_v40  ;;  %v791_v3 = vmul.f32 %v6481_v25, %v5440_v15  ;;  %v527_v21 = vmul.f32 %v6482_v34, %v5384_v52 }
  0xe0   : > { %v4496_v5 = vpack.c.bf16 %v886_v6, %v870_v49  ;;  %v824_v51 = vadd.f32 %v760_v39, %v594_v7  ;;  %v625_v2 = vadd.f32 %v5415_v62, %v541_v19  ;;  %v543_v26 = vmul.f32 %v6482_v34, %v5334_v8  ;;  %1395 = vmatprep.mubr.f32.mxu0 %v6473_v41  ;;  %v5772_v39 = vpop.permute.xlu0 %937 }
  0xe1   : > { %v872_v27 = vmax.f32 %v808_v12, 0.0  ;;  %v839_v4 = vadd.f32 %v775_v1, %v609_v0  ;;  %v611_v50 = vadd.f32 %v5404_v35, %v527_v21  ;;  %v777_v13 = vmul.f32 %v6483_v55, %v5398_v10  ;;  %4328 = vmatmul.mubr.msk.f32.gmra.mrb[18].mxu1 %vm950_vm0, %v5498_v48 }
  0xe2   : > { %4497 = vmatpush1.bf16.msra.mxu0 %v4496_v5  ;;  %v888_v25 = vmax.f32 %v824_v51, 0.0  ;;  %v855_v14 = vadd.f32 %v791_v3, %v625_v2  ;;  %v627_v30 = vadd.f32 %v5415_v62, %v543_v26  ;;  %v793_v34 = vmul.f32 %v6483_v55, %v5440_v15  ;;  %1484 = vmatprep.mubr.f32.mxu1 %v6473_v41 }
  0xe3   : > { %v903_v43 = vmax.f32 %v839_v4, 0.0  ;;  %v841_v28 = vadd.f32 %v777_v13, %v611_v50  ;;  %v524_v16 = vmul.f32 %v6484_v61, %v5384_v52  ;;  %v540_v17 = vmul.f32 %v6484_v61, %v5334_v8  ;;  %4325 = vmatmul.mubr.msk.f32.gmra.mrb[20].mxu0 %vm950_vm0, %v5527_v60 }
  0xe4   : > { %v4504_v18 = vpack.c.bf16 %v888_v25, %v872_v27  ;;  %v919_v59 = vmax.f32 %v855_v14, 0.0  ;;  %v857_v53 = vadd.f32 %v793_v34, %v627_v30  ;;  %v774_v31 = vmul.f32 %v6485_v23, %v5398_v10  ;;  %1401 = vmatprep.mubr.f32.mxu0 %v6473_v41 }
  0xe5   : > { %v905_v55 = vmax.f32 %v841_v28, 0.0  ;;  %v608_v57 = vadd.f32 %v5404_v35, %v524_v16  ;;  %v624_v44 = vadd.f32 %v5415_v62, %v540_v17  ;;  %v790_v36 = vmul.f32 %v6485_v23, %v5440_v15  ;;  %4329 = vmatmul.mubr.msk.f32.gmra.mrb[20].mxu1 %vm950_vm0, %v5527_v60 }
  0xe6   : > { %4505 = vmatpush1.bf16.msra.mxu1 %v4504_v18  ;;  %v4498_v61 = vpack.c.bf16 %v919_v59, %v903_v43  ;;  %v921_v33 = vmax.f32 %v857_v53, 0.0  ;;  %v526_v24 = vmul.f32 %v6486_v37, %v5384_v52  ;;  %v542_v47 = vmul.f32 %v6486_v37, %v5334_v8  ;;  %1490 = vmatprep.mubr.f32.mxu1 %v6473_v41 }
  0xe7   : > { %v838_v46 = vadd.f32 %v774_v31, %v608_v57  ;;  %v854_v54 = vadd.f32 %v790_v36, %v624_v44  ;;  %v776_v11 = vmul.f32 %v6487_v22, %v5398_v10  ;;  %v792_v23 = vmul.f32 %v6487_v22, %v5440_v15  ;;  %4326 = vmatmul.mubr.msk.f32.gmra.mrb[22].mxu0 %vm950_vm0, %v5549_v29 }
  0xe8   : > { %4499 = vmatprep.subr.bf16.mxu0 %v4498_v61  ;;  %v4506_v20 = vpack.c.bf16 %v921_v33, %v905_v55  ;;  %v610_v52 = vadd.f32 %v5404_v35, %v526_v24  ;;  %v626_v32 = vadd.f32 %v5415_v62, %v542_v47  ;;  %1561 = vmatprep.mubr.f32.mxu0 %v6473_v41  ;;  %v5770_v35 = vpop.permute.xlu1 %932 }
  0xe9   : > { %v902_v8 = vmax.f32 %v838_v46, 0.0  ;;  %v918_v37 = vmax.f32 %v854_v54, 0.0  ;;  %4330 = vmatmul.mubr.msk.f32.gmra.mrb[22].mxu1 %vm950_vm0, %v5549_v29 }
  0xea   : > { %4507 = vmatprep.subr.bf16.mxu1 %v4506_v20  ;;  %v840_v10 = vadd.f32 %v776_v11, %v610_v52  ;;  %v856_v45 = vadd.f32 %v792_v23, %v626_v32  ;;  %1650 = vmatprep.mubr.f32.mxu1 %v6473_v41 }
  0xeb   : > { %v4500_v15 = vpack.c.bf16 %v918_v37, %v902_v8 }
  0xec   : > { %v904_v9 = vmax.f32 %v840_v10, 0.0  ;;  %v920_v38 = vmax.f32 %v856_v45, 0.0  ;;  %v5780_v12 = vpop.permute.xlu1 %942 }
  0xed   : > { %4501 = vmatpush1.bf16.msra.mxu0 %v4500_v15 }
  0xee   : > { %v4508_v22 = vpack.c.bf16 %v920_v38, %v904_v9 }
  0xf0   : > { %4509 = vmatpush1.bf16.msra.mxu1 %v4508_v22  ;;  %4331 = vmatmul.mubr.msk.f32.vlgmr.msra.gmra.mrb[24].mxu0 %vm950_vm0, %v5475_v42  ;;  %v5785_v18 = vpop.permute.xlu1 %947 }
  0xf1   : > { %1567 = vmatprep.mubr.f32.mxu0 %v6473_v41 }
  0xf3   : > { %4335 = vmatmul.mubr.msk.f32.vlgmr.msra.gmra.mrb[24].mxu1 %vm950_vm0, %v5475_v42 }
  0xf4   : > { %1656 = vmatprep.mubr.f32.mxu1 %v6473_v41  ;;  %4332 = vmatmul.mubr.msk.f32.gmra.mrb[26].mxu0 %vm950_vm0, %v5498_v48 }
  0xf5   : > { %1573 = vmatprep.mubr.f32.mxu0 %v6473_v41 }
  0xf7   : > { %4336 = vmatmul.mubr.msk.f32.gmra.mrb[26].mxu1 %vm950_vm0, %v5498_v48 }
  0xf8   : > { %1662 = vmatprep.mubr.f32.mxu1 %v6473_v41  ;;  %4333 = vmatmul.mubr.msk.f32.gmra.mrb[28].mxu0 %vm950_vm0, %v5527_v60 }
  0xf9   : > { %1579 = vmatprep.mubr.f32.mxu0 %v6473_v41 }
  0xfb   : > { %4337 = vmatmul.mubr.msk.f32.gmra.mrb[28].mxu1 %vm950_vm0, %v5527_v60 }
  0xfc   : > { %1668 = vmatprep.mubr.f32.mxu1 %v6473_v41  ;;  %4334 = vmatmul.mubr.msk.f32.gmra.mrb[30].mxu0 %vm950_vm0, %v5549_v29 }
  0xfd   : > { %1843 = vmatprep.mubr.f32.mxu0 %v6473_v41 }
  0xff   : > { %4338 = vmatmul.mubr.msk.f32.gmra.mrb[30].mxu1 %vm950_vm0, %v5549_v29 }
 0x100   : > { %1932 = vmatprep.mubr.f32.mxu1 %v6473_v41 }
 0x18b   : > { %v1029_v62 = vpop.f32.mrb[0].mxu0  ;;  %v1118_v42 = vpop.f32.mrb[0].mxu1 }
 0x18c   : > { %v1031_v48 = vpop.f32.mrb[1].mxu0  ;;  %v1120_v56 = vpop.f32.mrb[1].mxu1  ;;  %v1030_v60 = vadd.f32 %v1029_v62, %v5770_v35  ;;  %v1119_v58 = vadd.f32 %v1118_v42, %v5770_v35 }
 0x18d   : > { %v1032_v49 = vadd.f32 %v1031_v48, %v5770_v35  ;;  %v1121_v63 = vadd.f32 %v1120_v56, %v5770_v35 }
 0x18e   : > { %v1675_v21 = vmax.f32 %v1030_v60, 0.0  ;;  %v1677_v5 = vmax.f32 %v1119_v58, 0.0 }
 0x18f   : > { %v1035_v40 = vpop.f32.mrb[2].mxu0  ;;  %v1124_v29 = vpop.f32.mrb[2].mxu1  ;;  %v1676_v26 = vmax.f32 %v1032_v49, 0.0  ;;  %v1678_v27 = vmax.f32 %v1121_v63, 0.0 }
 0x190   : > { %v1036_v6 = vadd.f32 %v1035_v40, %v5772_v39  ;;  %v1125_v7 = vadd.f32 %v1124_v29, %v5772_v39  ;;  %v1037_v19 = vpop.f32.mrb[3].mxu0  ;;  %v1126_v1 = vpop.f32.mrb[3].mxu1  ;;  %v5802_v29 = vld [vmem:[%s6435_s5] sm:$0xff] }
 0x191   : > { %v1038_v0 = vadd.f32 %v1037_v19, %v5772_v39  ;;  %v1127_v3 = vadd.f32 %v1126_v1, %v5772_v39 }
 0x192   : > { %v1691_v51 = vmax.f32 %v1036_v6, 0.0  ;;  %v1693_v2 = vmax.f32 %v1125_v7, 0.0 }
 0x193   : > { %v1692_v4 = vmax.f32 %v1038_v0, 0.0  ;;  %v1694_v50 = vmax.f32 %v1127_v3, 0.0  ;;  %v1130_v13 = vpop.f32.mrb[4].mxu1 }
 0x194   : > { %v4512_v25 = vpack.c.bf16 %v1691_v51, %v1675_v21  ;;  %v4520_v14 = vpack.c.bf16 %v1693_v2, %v1677_v5  ;;  %v1041_v30 = vpop.f32.mrb[4].mxu0  ;;  %v1132_v34 = vpop.f32.mrb[5].mxu1  ;;  %v1131_v17 = vadd.f32 %v1130_v13, %v5780_v12 }
 0x195   : > { %v4510_v43 = vpack.c.bf16 %v1692_v4, %v1676_v26  ;;  %v4518_v28 = vpack.c.bf16 %v1694_v50, %v1678_v27  ;;  %v1043_v16 = vpop.f32.mrb[5].mxu0  ;;  %v1042_v59 = vadd.f32 %v1041_v30, %v5780_v12  ;;  %v1133_v53 = vadd.f32 %v1132_v34, %v5780_v12 }
 0x196   : > { %v1044_v55 = vadd.f32 %v1043_v16, %v5780_v12  ;;  %v1709_v47 = vmax.f32 %v1131_v17, 0.0 }
 0x197   : > { %v1136_v31 = vpop.f32.mrb[6].mxu1  ;;  %4511 = vmatprep.subr.bf16.mxu0 %v4510_v43  ;;  %4519 = vmatprep.subr.bf16.mxu1 %v4518_v28  ;;  %v1707_v11 = vmax.f32 %v1042_v59, 0.0  ;;  %v1710_v23 = vmax.f32 %v1133_v53, 0.0 }
 0x198   : > { %v1047_v57 = vpop.f32.mrb[6].mxu0  ;;  %v1137_v44 = vadd.f32 %v1136_v31, %v5785_v18  ;;  %v1138_v36 = vpop.f32.mrb[7].mxu1  ;;  %4513 = vmatpush1.bf16.msra.mxu0 %v4512_v25  ;;  %4521 = vmatpush1.bf16.msra.mxu1 %v4520_v14  ;;  %v1708_v8 = vmax.f32 %v1044_v55, 0.0  ;;  %v5815_v14 = vld [vmem:[%s6435_s5 + $0x8] sm:$0xff] }
 0x199   : > { %v1048_v61 = vadd.f32 %v1047_v57, %v5785_v18  ;;  %v1049_v33 = vpop.f32.mrb[7].mxu0  ;;  %v1139_v24 = vadd.f32 %v1138_v36, %v5785_v18  ;;  %v5829_v57 = vld [vmem:[%s6435_s5 + $0x10] sm:$0xff] }
 0x19a   : > { %v1725_v46 = vmax.f32 %v1137_v44, 0.0  ;;  %v1050_v54 = vadd.f32 %v1049_v33, %v5785_v18 }
 0x19b   : > { %v1723_v20 = vmax.f32 %v1048_v61, 0.0  ;;  %v1726_v52 = vmax.f32 %v1139_v24, 0.0  ;;  %v1296_v32 = vpop.f32.mrb[8].mxu1 }
 0x19c   : > { %v4524_v37 = vpack.c.bf16 %v1725_v46, %v1709_v47  ;;  %v1724_v10 = vmax.f32 %v1050_v54, 0.0  ;;  %v1207_v45 = vpop.f32.mrb[8].mxu0  ;;  %v1298_v15 = vpop.f32.mrb[9].mxu1  ;;  %v1297_v42 = vadd.f32 %v1296_v32, %v5770_v35 }
 0x19d   : > { %v4516_v9 = vpack.c.bf16 %v1723_v20, %v1707_v11  ;;  %v4522_v38 = vpack.c.bf16 %v1726_v52, %v1710_v23  ;;  %v1209_v22 = vpop.f32.mrb[9].mxu0  ;;  %v1208_v48 = vadd.f32 %v1207_v45, %v5770_v35  ;;  %v1299_v56 = vadd.f32 %v1298_v15, %v5770_v35 }
 0x19e   : > { %v4514_v62 = vpack.c.bf16 %v1724_v10, %v1708_v8  ;;  %v1210_v58 = vadd.f32 %v1209_v22, %v5770_v35  ;;  %v1681_v1 = vmax.f32 %v1297_v42, 0.0 }
 0x19f   : > { %v1302_v60 = vpop.f32.mrb[10].mxu1  ;;  %4523 = vmatprep.subr.bf16.mxu1 %v4522_v38  ;;  %v1679_v21 = vmax.f32 %v1208_v48, 0.0  ;;  %v1682_v5 = vmax.f32 %v1299_v56, 0.0 }
 0x1a0   : > { %v1213_v49 = vpop.f32.mrb[10].mxu0  ;;  %v1303_v63 = vadd.f32 %v1302_v60, %v5772_v39  ;;  %4515 = vmatprep.subr.bf16.mxu0 %v4514_v62  ;;  %v1304_v40 = vpop.f32.mrb[11].mxu1  ;;  %4525 = vmatpush1.bf16.msra.mxu1 %v4524_v37  ;;  %v1680_v27 = vmax.f32 %v1210_v58, 0.0  ;;  %v5845_v37 = vld [vmem:[%s6435_s5 + $0x18] sm:$0xff] }
 0x1a1   : > { %v1214_v6 = vadd.f32 %v1213_v49, %v5772_v39  ;;  %v1215_v7 = vpop.f32.mrb[11].mxu0  ;;  %v1305_v19 = vadd.f32 %v1304_v40, %v5772_v39  ;;  %4517 = vmatpush1.bf16.msra.mxu0 %v4516_v9 }
 0x1a2   : > { %v1697_v0 = vmax.f32 %v1303_v63, 0.0  ;;  %v1216_v3 = vadd.f32 %v1215_v7, %v5772_v39 }
 0x1a3   : > { %v1695_v51 = vmax.f32 %v1214_v6, 0.0  ;;  %v1698_v2 = vmax.f32 %v1305_v19, 0.0  ;;  %v1308_v26 = vpop.f32.mrb[12].mxu1  ;;  %4343 = vmatmul.mubr.msk.f32.vlgmr.msra.gmra.mrb[32].mxu1 %vm950_vm0, %v5802_v29 }
 0x1a4   : > { %v4536_v4 = vpack.c.bf16 %v1697_v0, %v1681_v1  ;;  %v1696_v50 = vmax.f32 %v1216_v3, 0.0  ;;  %v1219_v13 = vpop.f32.mrb[12].mxu0  ;;  %4339 = vmatmul.mubr.msk.f32.vlgmr.msra.gmra.mrb[32].mxu0 %vm950_vm0, %v5802_v29  ;;  %v1310_v25 = vpop.f32.mrb[13].mxu1  ;;  %1938 = vmatprep.mubr.f32.mxu1 %v6473_v41  ;;  %v1309_v17 = vadd.f32 %v1308_v26, %v5780_v12 }
 0x1a5   : > { %v4528_v30 = vpack.c.bf16 %v1695_v51, %v1679_v21  ;;  %v4534_v34 = vpack.c.bf16 %v1698_v2, %v1682_v5  ;;  %v1221_v43 = vpop.f32.mrb[13].mxu0  ;;  %1849 = vmatprep.mubr.f32.mxu0 %v6473_v41  ;;  %v1220_v16 = vadd.f32 %v1219_v13, %v5780_v12  ;;  %v1311_v53 = vadd.f32 %v1310_v25, %v5780_v12 }
 0x1a6   : > { %v4526_v28 = vpack.c.bf16 %v1696_v50, %v1680_v27  ;;  %v1222_v59 = vadd.f32 %v1221_v43, %v5780_v12  ;;  %v1713_v54 = vmax.f32 %v1309_v17, 0.0 }
 0x1a7   : > { %4344 = vmatmul.mubr.msk.f32.gmra.mrb[34].mxu1 %vm950_vm0, %v5815_v14  ;;  %4535 = vmatprep.subr.bf16.mxu1 %v4534_v34  ;;  %v1711_v46 = vmax.f32 %v1220_v16, 0.0  ;;  %v1714_v52 = vmax.f32 %v1311_v53, 0.0 }
 0x1a8   : > { %v1225_v31 = vpop.f32.mrb[14].mxu0  ;;  %v1314_v55 = vpop.f32.mrb[14].mxu1  ;;  %4340 = vmatmul.mubr.msk.f32.gmra.mrb[34].mxu0 %vm950_vm0, %v5815_v14  ;;  %4527 = vmatprep.subr.bf16.mxu0 %v4526_v28  ;;  %v1712_v20 = vmax.f32 %v1222_v59, 0.0 }
 0x1a9   : > { %v1226_v44 = vadd.f32 %v1225_v31, %v5785_v18  ;;  %v1315_v36 = vadd.f32 %v1314_v55, %v5785_v18  ;;  %v1227_v61 = vpop.f32.mrb[15].mxu0  ;;  %v1316_v33 = vpop.f32.mrb[15].mxu1  ;;  %4529 = vmatpush1.bf16.msra.mxu0 %v4528_v30  ;;  %4537 = vmatpush1.bf16.msra.mxu1 %v4536_v4 }
 0x1aa   : > { %v1228_v24 = vadd.f32 %v1227_v61, %v5785_v18  ;;  %v1317_v47 = vadd.f32 %v1316_v33, %v5785_v18  ;;  %1855 = vmatprep.mubr.f32.mxu0 %v6473_v41  ;;  %1944 = vmatprep.mubr.f32.mxu1 %v6473_v41 }
 0x1ab   : > { %v1727_v11 = vmax.f32 %v1226_v44, 0.0  ;;  %v1729_v23 = vmax.f32 %v1315_v36, 0.0  ;;  %4345 = vmatmul.mubr.msk.f32.gmra.mrb[36].mxu1 %vm950_vm0, %v5829_v57 }
 0x1ac   : > { %v1728_v32 = vmax.f32 %v1228_v24, 0.0  ;;  %v1730_v8 = vmax.f32 %v1317_v47, 0.0  ;;  %4341 = vmatmul.mubr.msk.f32.gmra.mrb[36].mxu0 %vm950_vm0, %v5829_v57  ;;  %1950 = vmatprep.mubr.f32.mxu1 %v6473_v41 }
 0x1ad   : > { %v4532_v10 = vpack.c.bf16 %v1727_v11, %v1711_v46  ;;  %v4540_v45 = vpack.c.bf16 %v1729_v23, %v1713_v54  ;;  %v1385_v15 = vpop.f32.mrb[16].mxu0  ;;  %1861 = vmatprep.mubr.f32.mxu0 %v6473_v41 }
 0x1ae   : > { %v4530_v9 = vpack.c.bf16 %v1728_v32, %v1712_v20  ;;  %v4538_v38 = vpack.c.bf16 %v1730_v8, %v1714_v52  ;;  %v1387_v22 = vpop.f32.mrb[17].mxu0  ;;  %v1386_v62 = vadd.f32 %v1385_v15, %v5770_v35 }
 0x1af   : > { %4346 = vmatmul.mubr.msk.f32.gmra.mrb[38].mxu1 %vm950_vm0, %v5845_v37  ;;  %v1388_v48 = vadd.f32 %v1387_v22, %v5770_v35 }
 0x1b0   : > { %v1474_v42 = vpop.f32.mrb[16].mxu1  ;;  %4342 = vmatmul.mubr.msk.f32.gmra.mrb[38].mxu0 %vm950_vm0, %v5845_v37  ;;  %4531 = vmatprep.subr.bf16.mxu0 %v4530_v9  ;;  %v1683_v6 = vmax.f32 %v1386_v62, 0.0 }
 0x1b1   : > { %v1476_v56 = vpop.f32.mrb[17].mxu1  ;;  %v1391_v60 = vpop.f32.mrb[18].mxu0  ;;  %4539 = vmatprep.subr.bf16.mxu1 %v4538_v38  ;;  %4533 = vmatpush1.bf16.msra.mxu0 %v4532_v10  ;;  %v1475_v63 = vadd.f32 %v1474_v42, %v5770_v35  ;;  %v1684_v0 = vmax.f32 %v1388_v48, 0.0 }
 0x1b2   : > { %v1392_v58 = vadd.f32 %v1391_v60, %v5772_v39  ;;  %v1393_v49 = vpop.f32.mrb[19].mxu0  ;;  %4541 = vmatpush1.bf16.msra.mxu1 %v4540_v45  ;;  %2021 = vmatprep.mubr.f32.mxu0 %v6473_v41  ;;  %v1477_v7 = vadd.f32 %v1476_v56, %v5770_v35 }
 0x1b3   : > { %v1394_v40 = vadd.f32 %v1393_v49, %v5772_v39  ;;  %2110 = vmatprep.mubr.f32.mxu1 %v6473_v41  ;;  %v1685_v27 = vmax.f32 %v1475_v63, 0.0 }
 0x1b4   : > { %v1699_v19 = vmax.f32 %v1392_v58, 0.0  ;;  %v1480_v1 = vpop.f32.mrb[18].mxu1  ;;  %4347 = vmatmul.mubr.msk.f32.vlgmr.msra.gmra.mrb[40].mxu0 %vm950_vm0, %v5802_v29  ;;  %v1686_v25 = vmax.f32 %v1477_v7, 0.0 }
 0x1b5   : > { %v1481_v3 = vadd.f32 %v1480_v1, %v5772_v39  ;;  %v1700_v21 = vmax.f32 %v1394_v40, 0.0  ;;  %v1482_v5 = vpop.f32.mrb[19].mxu1  ;;  %4351 = vmatmul.mubr.msk.f32.vlgmr.msra.gmra.mrb[40].mxu1 %vm950_vm0, %v5802_v29  ;;  %2027 = vmatprep.mubr.f32.mxu0 %v6473_v41 }
 0x1b6   : > { %v4544_v51 = vpack.c.bf16 %v1699_v19, %v1683_v6  ;;  %v1483_v2 = vadd.f32 %v1482_v5, %v5772_v39  ;;  %v1397_v26 = vpop.f32.mrb[20].mxu0  ;;  %2116 = vmatprep.mubr.f32.mxu1 %v6473_v41 }
 0x1b7   : > { %v1701_v4 = vmax.f32 %v1481_v3, 0.0  ;;  %v4542_v50 = vpack.c.bf16 %v1700_v21, %v1684_v0  ;;  %v1399_v13 = vpop.f32.mrb[21].mxu0  ;;  %v1398_v28 = vadd.f32 %v1397_v26, %v5780_v12 }
 0x1b8   : > { %v1702_v30 = vmax.f32 %v1483_v2, 0.0  ;;  %v1486_v34 = vpop.f32.mrb[20].mxu1  ;;  %4348 = vmatmul.mubr.msk.f32.gmra.mrb[42].mxu0 %vm950_vm0, %v5815_v14  ;;  %v1400_v59 = vadd.f32 %v1399_v13, %v5780_v12 }
 0x1b9   : > { %v4552_v43 = vpack.c.bf16 %v1701_v4, %v1685_v27  ;;  %v1488_v16 = vpop.f32.mrb[21].mxu1  ;;  %4352 = vmatmul.mubr.msk.f32.gmra.mrb[42].mxu1 %vm950_vm0, %v5815_v14  ;;  %4543 = vmatprep.subr.bf16.mxu0 %v4542_v50  ;;  %v1487_v31 = vadd.f32 %v1486_v34, %v5780_v12  ;;  %v1715_v24 = vmax.f32 %v1398_v28, 0.0 }
 0x1ba   : > { %v4550_v17 = vpack.c.bf16 %v1702_v30, %v1686_v25  ;;  %v1403_v53 = vpop.f32.mrb[22].mxu0  ;;  %4545 = vmatpush1.bf16.msra.mxu0 %v4544_v51  ;;  %2033 = vmatprep.mubr.f32.mxu0 %v6473_v41  ;;  %v1489_v36 = vadd.f32 %v1488_v16, %v5780_v12  ;;  %v1716_v11 = vmax.f32 %v1400_v59, 0.0 }
 0x1bb   : > { %v1404_v55 = vadd.f32 %v1403_v53, %v5785_v18  ;;  %v1405_v44 = vpop.f32.mrb[23].mxu0  ;;  %2122 = vmatprep.mubr.f32.mxu1 %v6473_v41  ;;  %v1717_v52 = vmax.f32 %v1487_v31, 0.0 }
 0x1bc   : > { %v1492_v61 = vpop.f32.mrb[22].mxu1  ;;  %4551 = vmatprep.subr.bf16.mxu1 %v4550_v17  ;;  %v1406_v33 = vadd.f32 %v1405_v44, %v5785_v18  ;;  %4349 = vmatmul.mubr.msk.f32.gmra.mrb[44].mxu0 %vm950_vm0, %v5829_v57  ;;  %v1718_v10 = vmax.f32 %v1489_v36, 0.0 }
 0x1bd   : > { %v1731_v47 = vmax.f32 %v1404_v55, 0.0  ;;  %v1493_v46 = vadd.f32 %v1492_v61, %v5785_v18  ;;  %v1494_v54 = vpop.f32.mrb[23].mxu1  ;;  %4553 = vmatpush1.bf16.msra.mxu1 %v4552_v43  ;;  %2039 = vmatprep.mubr.f32.mxu0 %v6473_v41 }
 0x1be   : > { %v1732_v23 = vmax.f32 %v1406_v33, 0.0  ;;  %v1495_v20 = vadd.f32 %v1494_v54, %v5785_v18  ;;  %4353 = vmatmul.mubr.msk.f32.gmra.mrb[44].mxu1 %vm950_vm0, %v5829_v57 }
 0x1bf   : > { %v4548_v32 = vpack.c.bf16 %v1731_v47, %v1715_v24  ;;  %v1733_v8 = vmax.f32 %v1493_v46, 0.0  ;;  %2128 = vmatprep.mubr.f32.mxu1 %v6473_v41 }
 0x1c0   : > { %v4546_v45 = vpack.c.bf16 %v1732_v23, %v1716_v11  ;;  %v1734_v15 = vmax.f32 %v1495_v20, 0.0  ;;  %4350 = vmatmul.mubr.msk.f32.gmra.mrb[46].mxu0 %vm950_vm0, %v5845_v37 }
 0x1c1   : > { %v4556_v9 = vpack.c.bf16 %v1733_v8, %v1717_v52  ;;  %2199 = vmatprep.mubr.f32.mxu0 %v6473_v41 }
 0x1c2   : > { %v4554_v38 = vpack.c.bf16 %v1734_v15, %v1718_v10  ;;  %4354 = vmatmul.mubr.msk.f32.gmra.mrb[46].mxu1 %vm950_vm0, %v5845_v37  ;;  %4547 = vmatprep.subr.bf16.mxu0 %v4546_v45 }
 0x1c3   : > { %v1563_v22 = vpop.f32.mrb[24].mxu0  ;;  %4549 = vmatpush1.bf16.msra.mxu0 %v4548_v32  ;;  %2288 = vmatprep.mubr.f32.mxu1 %v6473_v41 }
 0x1c4   : > { %v1565_v62 = vpop.f32.mrb[25].mxu0  ;;  %4555 = vmatprep.subr.bf16.mxu1 %v4554_v38  ;;  %v1564_v42 = vadd.f32 %v1563_v22, %v5770_v35 }
 0x1c5   : > { %4557 = vmatpush1.bf16.msra.mxu1 %v4556_v9  ;;  %v1566_v56 = vadd.f32 %v1565_v62, %v5770_v35 }
 0x1c6   : > { %v1652_v48 = vpop.f32.mrb[24].mxu1  ;;  %4355 = vmatmul.mubr.msk.f32.vlgmr.msra.gmra.mrb[48].mxu0 %vm950_vm0, %v5802_v29  ;;  %v1687_v7 = vmax.f32 %v1564_v42, 0.0 }
 0x1c7   : > { %v1654_v60 = vpop.f32.mrb[25].mxu1  ;;  %v1569_v58 = vpop.f32.mrb[26].mxu0  ;;  %2205 = vmatprep.mubr.f32.mxu0 %v6473_v41  ;;  %v1653_v40 = vadd.f32 %v1652_v48, %v5770_v35  ;;  %v1688_v3 = vmax.f32 %v1566_v56, 0.0 }
 0x1c8   : > { %v1570_v49 = vadd.f32 %v1569_v58, %v5772_v39  ;;  %v1571_v63 = vpop.f32.mrb[27].mxu0  ;;  %4359 = vmatmul.mubr.msk.f32.vlgmr.msra.gmra.mrb[48].mxu1 %vm950_vm0, %v5802_v29  ;;  %v1655_v19 = vadd.f32 %v1654_v60, %v5770_v35  ;;  %v5964_v56 = vpop.permute.xlu1 %1754 }
 0x1c9   : > { %v1572_v6 = vadd.f32 %v1571_v63, %v5772_v39  ;;  %2294 = vmatprep.mubr.f32.mxu1 %v6473_v41  ;;  %v1689_v35 = vmax.f32 %v1653_v40, 0.0 }
 0x1ca   : > { %v1703_v1 = vmax.f32 %v1570_v49, 0.0  ;;  %v1658_v0 = vpop.f32.mrb[26].mxu1  ;;  %4356 = vmatmul.mubr.msk.f32.gmra.mrb[50].mxu0 %vm950_vm0, %v5815_v14  ;;  %v1690_v25 = vmax.f32 %v1655_v19, 0.0 }
 0x1cb   : > { %v1659_v21 = vadd.f32 %v1658_v0, %v5772_v39  ;;  %v1704_v5 = vmax.f32 %v1572_v6, 0.0  ;;  %v1660_v51 = vpop.f32.mrb[27].mxu1  ;;  %v1575_v2 = vpop.f32.mrb[28].mxu0  ;;  %2211 = vmatprep.mubr.f32.mxu0 %v6473_v41 }
 0x1cc   : > { %v4560_v26 = vpack.c.bf16 %v1703_v1, %v1687_v7  ;;  %v1661_v27 = vadd.f32 %v1660_v51, %v5772_v39  ;;  %v1577_v4 = vpop.f32.mrb[29].mxu0  ;;  %4360 = vmatmul.mubr.msk.f32.gmra.mrb[50].mxu1 %vm950_vm0, %v5815_v14  ;;  %v1576_v34 = vadd.f32 %v1575_v2, %v5780_v12 }
 0x1cd   : > { %v1705_v50 = vmax.f32 %v1659_v21, 0.0  ;;  %v4558_v13 = vpack.c.bf16 %v1704_v5, %v1688_v3  ;;  %2300 = vmatprep.mubr.f32.mxu1 %v6473_v41  ;;  %v1578_v16 = vadd.f32 %v1577_v4, %v5780_v12 }
 0x1ce   : > { %v1706_v30 = vmax.f32 %v1661_v27, 0.0  ;;  %v1664_v43 = vpop.f32.mrb[28].mxu1  ;;  %4357 = vmatmul.mubr.msk.f32.gmra.mrb[52].mxu0 %vm950_vm0, %v5829_v57  ;;  %v1719_v36 = vmax.f32 %v1576_v34, 0.0 }
 0x1cf   : > { %v4568_v28 = vpack.c.bf16 %v1705_v50, %v1689_v35  ;;  %v1665_v39 = vadd.f32 %v1664_v43, %v5780_v12  ;;  %v1666_v17 = vpop.f32.mrb[29].mxu1  ;;  %v1581_v59 = vpop.f32.mrb[30].mxu0  ;;  %4559 = vmatprep.subr.bf16.mxu0 %v4558_v13  ;;  %2217 = vmatprep.mubr.f32.mxu0 %v6473_v41  ;;  %v1720_v47 = vmax.f32 %v1578_v16, 0.0 }
 0x1d0   : > { %v4566_v53 = vpack.c.bf16 %v1706_v30, %v1690_v25  ;;  %v1582_v31 = vadd.f32 %v1581_v59, %v5785_v18  ;;  %v1583_v55 = vpop.f32.mrb[31].mxu0  ;;  %4561 = vmatpush1.bf16.msra.mxu0 %v4560_v26  ;;  %4361 = vmatmul.mubr.msk.f32.gmra.mrb[52].mxu1 %vm950_vm0, %v5829_v57  ;;  %v1667_v61 = vadd.f32 %v1666_v17, %v5780_v12  ;;  %v5976_v43 = vpop.permute.xlu1 %1764 }
 0x1d1   : > { %v1584_v44 = vadd.f32 %v1583_v55, %v5785_v18  ;;  %2306 = vmatprep.mubr.f32.mxu1 %v6473_v41  ;;  %v1721_v12 = vmax.f32 %v1665_v39, 0.0 }
 0x1d2   : > { %v1735_v33 = vmax.f32 %v1582_v31, 0.0  ;;  %v1670_v24 = vpop.f32.mrb[30].mxu1  ;;  %4567 = vmatprep.subr.bf16.mxu1 %v4566_v53  ;;  %4358 = vmatmul.mubr.msk.f32.gmra.mrb[54].mxu0 %vm950_vm0, %v5845_v37  ;;  %v1722_v8 = vmax.f32 %v1667_v61, 0.0 }
 0x1d3   : > { %v1671_v46 = vadd.f32 %v1670_v24, %v5785_v18  ;;  %v1736_v54 = vmax.f32 %v1584_v44, 0.0  ;;  %v1672_v11 = vpop.f32.mrb[31].mxu1  ;;  %4569 = vmatpush1.bf16.msra.mxu1 %v4568_v28  ;;  %2377 = vmatprep.mubr.f32.mxu0 %v6473_v41 }
 0x1d4   : > { %v4564_v23 = vpack.c.bf16 %v1735_v33, %v1719_v36  ;;  %v1673_v20 = vadd.f32 %v1672_v11, %v5785_v18  ;;  %4362 = vmatmul.mubr.msk.f32.gmra.mrb[54].mxu1 %vm950_vm0, %v5845_v37  ;;  %v5958_v18 = vpop.permute.xlu0 %1749 }
 0x1d5   : > { %v1737_v52 = vmax.f32 %v1671_v46, 0.0  ;;  %v4562_v32 = vpack.c.bf16 %v1736_v54, %v1720_v47  ;;  %2466 = vmatprep.mubr.f32.mxu1 %v6473_v41 }
 0x1d6   : > { %v1738_v10 = vmax.f32 %v1673_v20, 0.0 }
 0x1d7   : > { %v4572_v45 = vpack.c.bf16 %v1737_v52, %v1721_v12  ;;  %4563 = vmatprep.subr.bf16.mxu0 %v4562_v32 }
 0x1d8   : > { %v4570_v15 = vpack.c.bf16 %v1738_v10, %v1722_v8  ;;  %4565 = vmatpush1.bf16.msra.mxu0 %v4564_v23  ;;  %v5970_v21 = vpop.permute.xlu0 %1759 }
 0x1da   : > { %4571 = vmatprep.subr.bf16.mxu1 %v4570_v15 }
 0x1db   : > { %4573 = vmatpush1.bf16.msra.mxu1 %v4572_v45  ;;  %4363 = vmatmul.mubr.msk.f32.vlgmr.msra.gmra.mrb[56].mxu0 %vm950_vm0, %v5802_v29 }
 0x1dc   : > { %2383 = vmatprep.mubr.f32.mxu0 %v6473_v41 }
 0x1de   : > { %4367 = vmatmul.mubr.msk.f32.vlgmr.msra.gmra.mrb[56].mxu1 %vm950_vm0, %v5802_v29 }
 0x1df   : > { %2472 = vmatprep.mubr.f32.mxu1 %v6473_v41  ;;  %4364 = vmatmul.mubr.msk.f32.gmra.mrb[58].mxu0 %vm950_vm0, %v5815_v14 }
 0x1e0   : > { %2389 = vmatprep.mubr.f32.mxu0 %v6473_v41 }
 0x1e2   : > { %4368 = vmatmul.mubr.msk.f32.gmra.mrb[58].mxu1 %vm950_vm0, %v5815_v14 }
 0x1e3   : > { %2478 = vmatprep.mubr.f32.mxu1 %v6473_v41  ;;  %4365 = vmatmul.mubr.msk.f32.gmra.mrb[60].mxu0 %vm950_vm0, %v5829_v57 }
 0x1e4   : > { %2395 = vmatprep.mubr.f32.mxu0 %v6473_v41 }
 0x1e6   : > { %4369 = vmatmul.mubr.msk.f32.gmra.mrb[60].mxu1 %vm950_vm0, %v5829_v57 }
 0x1e7   : > { %2484 = vmatprep.mubr.f32.mxu1 %v6473_v41  ;;  %4366 = vmatmul.mubr.msk.f32.gmra.mrb[62].mxu0 %vm950_vm0, %v5845_v37 }
 0x1e8   : > { %2953 = vmatprep.mubr.f32.mxu0 %v6473_v41 }
 0x1ea   : > { %4370 = vmatmul.mubr.msk.f32.gmra.mrb[62].mxu1 %vm950_vm0, %v5845_v37 }
 0x1eb   : > { %3024 = vmatprep.mubr.f32.mxu1 %v6473_v41 }
 0x276   : > { %v1934_v29 = vpop.f32.mrb[32].mxu1 }
 0x277   : > { %v1845_v14 = vpop.f32.mrb[32].mxu0  ;;  %v1935_v9 = vadd.f32 %v1934_v29, %v5958_v18  ;;  %v1936_v38 = vpop.f32.mrb[33].mxu1 }
 0x278   : > { %v1846_v57 = vadd.f32 %v1845_v14, %v5958_v18  ;;  %v1847_v22 = vpop.f32.mrb[33].mxu0  ;;  %v1937_v62 = vadd.f32 %v1936_v38, %v5958_v18 }
 0x279   : > { %v4373_v42 = vmul.f32 -1.442695, %v1935_v9  ;;  %v1848_v48 = vadd.f32 %v1847_v22, %v5958_v18 }
 0x27a   : > { %v4371_v37 = vmul.f32 -1.442695, %v1846_v57  ;;  %v4374_v60 = vmul.f32 -1.442695, %v1937_v62  ;;  %v1940_v58 = vpop.f32.mrb[34].mxu1 }
 0x27b   : > { %4749 = vpow2.f32 %v4373_v42  ;;  %v4372_v49 = vmul.f32 -1.442695, %v1848_v48  ;;  %v1851_v63 = vpop.f32.mrb[34].mxu0  ;;  %v1941_v40 = vadd.f32 %v1940_v58, %v5964_v56  ;;  %v1942_v6 = vpop.f32.mrb[35].mxu1 }
 0x27c   : > { %4751 = vpow2.f32 %v4371_v37  ;;  %v1852_v7 = vadd.f32 %v1851_v63, %v5964_v56  ;;  %v1853_v19 = vpop.f32.mrb[35].mxu0  ;;  %v1943_v1 = vadd.f32 %v1942_v6, %v5964_v56 }
 0x27d   : > { %4753 = vpow2.f32 %v4372_v49  ;;  %v4389_v0 = vmul.f32 -1.442695, %v1941_v40  ;;  %v1854_v3 = vadd.f32 %v1853_v19, %v5964_v56 }
 0x27e   : > { %4755 = vpow2.f32 %v4374_v60  ;;  %v4387_v5 = vmul.f32 -1.442695, %v1852_v7  ;;  %v4390_v51 = vmul.f32 -1.442695, %v1943_v1  ;;  %v1946_v2 = vpop.f32.mrb[36].mxu1 }
 0x27f   : > { %4757 = vpow2.f32 %v4389_v0  ;;  %v4388_v26 = vmul.f32 -1.442695, %v1854_v3  ;;  %v1857_v27 = vpop.f32.mrb[36].mxu0  ;;  %v1947_v4 = vadd.f32 %v1946_v2, %v5970_v21  ;;  %v1948_v35 = vpop.f32.mrb[37].mxu1 }
 0x280   : > { %4759 = vpow2.f32 %v4387_v5  ;;  %v1858_v50 = vadd.f32 %v1857_v27, %v5970_v21  ;;  %v1859_v13 = vpop.f32.mrb[37].mxu0  ;;  %v1949_v25 = vadd.f32 %v1948_v35, %v5970_v21 }
 0x281   : > { %4761 = vpow2.f32 %v4388_v26  ;;  %v4405_v30 = vmul.f32 -1.442695, %v1947_v4  ;;  %v1860_v34 = vadd.f32 %v1859_v13, %v5970_v21 }
 0x282   : > { %4763 = vpow2.f32 %v4390_v51  ;;  %v4403_v28 = vmul.f32 -1.442695, %v1858_v50  ;;  %v4406_v39 = vmul.f32 -1.442695, %v1949_v25  ;;  %v1952_v16 = vpop.f32.mrb[38].mxu1 }
 0x283   : > { %4765 = vpow2.f32 %v4405_v30  ;;  %v4404_v17 = vmul.f32 -1.442695, %v1860_v34  ;;  %v1863_v59 = vpop.f32.mrb[38].mxu0  ;;  %v1953_v53 = vadd.f32 %v1952_v16, %v5976_v43  ;;  %v1954_v31 = vpop.f32.mrb[39].mxu1 }
 0x284   : > { %4767 = vpow2.f32 %v4403_v28  ;;  %v1865_v55 = vpop.f32.mrb[39].mxu0  ;;  %v1864_v38 = vadd.f32 %v1863_v59, %v5976_v43  ;;  %v1955_v40 = vadd.f32 %v1954_v31, %v5976_v43 }
 0x285   : > { %v4750_v44 = vpop.eup %4749  ;;  %4769 = vpow2.f32 %v4404_v17  ;;  %v4421_v36 = vmul.f32 -1.442695, %v1953_v53  ;;  %v1866_v58 = vadd.f32 %v1865_v55, %v5976_v43 }
 0x286   : > { %v4752_v61 = vpop.eup %4751  ;;  %v2685_v33 = vadd.f32 1.0, %v4750_v44  ;;  %4771 = vpow2.f32 %v4406_v39  ;;  %v4419_v1 = vmul.f32 -1.442695, %v1864_v38  ;;  %v4422_v30 = vmul.f32 -1.442695, %v1955_v40 }
 0x287   : > { %v4754_v24 = vpop.eup %4753  ;;  %v2683_v47 = vadd.f32 1.0, %v4752_v61  ;;  %4773 = vpow2.f32 %v4421_v36  ;;  %v2023_v46 = vpop.f32.mrb[40].mxu0  ;;  %v4420_v35 = vmul.f32 -1.442695, %v1866_v58 }
 0x288   : > { %v4756_v54 = vpop.eup %4755  ;;  %4775 = vrcp.f32 %v2685_v33  ;;  %v2684_v11 = vadd.f32 1.0, %v4754_v24  ;;  %v2112_v23 = vpop.f32.mrb[40].mxu1  ;;  %v2024_v0 = vadd.f32 %v2023_v46, %v5958_v18 }
 0x289   : > { %v2025_v20 = vpop.f32.mrb[41].mxu0  ;;  %v4758_v12 = vpop.eup %4757  ;;  %4777 = vrcp.f32 %v2683_v47  ;;  %v2686_v52 = vadd.f32 1.0, %v4756_v54  ;;  %v2113_v2 = vadd.f32 %v2112_v23, %v5958_v18 }
 0x28a   : > { %v2114_v32 = vpop.f32.mrb[41].mxu1  ;;  %v4760_v8 = vpop.eup %4759  ;;  %4779 = vrcp.f32 %v2684_v11  ;;  %v2701_v10 = vadd.f32 1.0, %v4758_v12  ;;  %v2026_v50 = vadd.f32 %v2025_v20, %v5958_v18  ;;  %v4375_v16 = vmul.f32 -1.442695, %v2024_v0 }
 0x28b   : > { %v4762_v45 = vpop.eup %4761  ;;  %4781 = vrcp.f32 %v2686_v52  ;;  %v2699_v15 = vadd.f32 1.0, %v4760_v8  ;;  %v2029_v29 = vpop.f32.mrb[42].mxu0  ;;  %v2115_v34 = vadd.f32 %v2114_v32, %v5958_v18  ;;  %v4377_v31 = vmul.f32 -1.442695, %v2113_v2 }
 0x28c   : > { %v4764_v14 = vpop.eup %4763  ;;  %4783 = vrcp.f32 %v2701_v10  ;;  %v2700_v9 = vadd.f32 1.0, %v4762_v45  ;;  %v2118_v57 = vpop.f32.mrb[42].mxu1  ;;  %v2030_v17 = vadd.f32 %v2029_v29, %v5964_v56  ;;  %v4376_v61 = vmul.f32 -1.442695, %v2026_v50 }
 0x28d   : > { %v2031_v22 = vpop.f32.mrb[43].mxu0  ;;  %v4766_v62 = vpop.eup %4765  ;;  %4785 = vrcp.f32 %v2699_v15  ;;  %v2702_v42 = vadd.f32 1.0, %v4764_v14  ;;  %v2119_v55 = vadd.f32 %v2118_v57, %v5964_v56  ;;  %v4378_v46 = vmul.f32 -1.442695, %v2115_v34 }
 0x28e   : > { %v2120_v48 = vpop.f32.mrb[43].mxu1  ;;  %v4768_v37 = vpop.eup %4767  ;;  %4787 = vrcp.f32 %v2700_v9  ;;  %v2717_v60 = vadd.f32 1.0, %v4766_v62  ;;  %v2032_v33 = vadd.f32 %v2031_v22, %v5964_v56  ;;  %v4391_v20 = vmul.f32 -1.442695, %v2030_v17 }
 0x28f   : > { %v4770_v49 = vpop.eup %4769  ;;  %4789 = vrcp.f32 %v2702_v42  ;;  %v2715_v63 = vadd.f32 1.0, %v4768_v37  ;;  %v2035_v6 = vpop.f32.mrb[44].mxu0  ;;  %v2121_v54 = vadd.f32 %v2120_v48, %v5964_v56  ;;  %v4393_v8 = vmul.f32 -1.442695, %v2119_v55 }
 0x290   : > { %v4772_v7 = vpop.eup %4771  ;;  %4791 = vrcp.f32 %v2717_v60  ;;  %v2716_v19 = vadd.f32 1.0, %v4770_v49  ;;  %v5983_v3 = vpop.f32.mrb[45].mxu0  ;;  %v2036_v12 = vadd.f32 %v2035_v6, %v5970_v21  ;;  %v4392_v29 = vmul.f32 -1.442695, %v2032_v33 }
 0x291   : > { %v4774_v5 = vpop.eup %4773  ;;  %4793 = vrcp.f32 %v2715_v63  ;;  %v2718_v51 = vadd.f32 1.0, %v4772_v7  ;;  %v2124_v26 = vpop.f32.mrb[44].mxu1  ;;  %v4394_v22 = vmul.f32 -1.442695, %v2121_v54 }
 0x292   : > { %v4776_v27 = vpop.eup %4775  ;;  %4795 = vrcp.f32 %v2716_v19  ;;  %v2733_v4 = vadd.f32 1.0, %v4774_v5  ;;  %v5987_v13 = vpop.f32.mrb[45].mxu1  ;;  %v2125_v14 = vadd.f32 %v2124_v26, %v5970_v21  ;;  %v4407_v48 = vmul.f32 -1.442695, %v2036_v12 }
 0x293   : > { %v4778_v25 = vpop.eup %4777  ;;  %4797 = vrcp.f32 %v2718_v51  ;;  %v5990_v28 = vpop.f32.mrb[46].mxu0  ;;  %v2127_v12 = vadd.f32 %v5987_v13, %v5970_v21 }
 0x294   : > { %v4780_v39 = vpop.eup %4779  ;;  %4799 = vpow2.f32 %v4419_v1  ;;  %v5993_v59 = vpop.f32.mrb[47].mxu0  ;;  %v4409_v63 = vmul.f32 -1.442695, %v2125_v14 }
 0x295   : > { %v4782_v53 = vpop.eup %4781  ;;  %4801 = vrcp.f32 %v2733_v4  ;;  %v5996_v44 = vpop.f32.mrb[46].mxu1  ;;  %v2044_v13 = vadd.f32 %v5993_v59, %v5976_v43 }
 0x296   : > { %v4784_v36 = vpop.eup %4783  ;;  %4803 = vpow2.f32 %v4420_v35  ;;  %v5999_v24 = vpop.f32.mrb[47].mxu1 }
 0x297   : > { %v4786_v47 = vpop.eup %4785  ;;  %4805 = vpow2.f32 %v4422_v30  ;;  %v6002_v11 = vpack.c.bf16 %v4784_v36, %v4776_v27 }
 0x298   : > { %v4788_v23 = vpop.eup %4787  ;;  %4807 = vpow2.f32 %v4375_v16  ;;  %v6005_v52 = vpack.c.bf16 %v4786_v47, %v4778_v25 }
 0x299   : > { %v4790_v32 = vpop.eup %4789  ;;  %4809 = vpow2.f32 %v4377_v31  ;;  %v6007_v10 = vpop.f32.mrb[48].mxu0  ;;  %v6009_v45 = vpack.c.bf16 %v4788_v23, %v4780_v39 }
 0x29a   : > { %v4792_v15 = vpop.eup %4791  ;;  %4811 = vpow2.f32 %v4376_v61  ;;  %v6012_v9 = vpop.f32.mrb[49].mxu0  ;;  %v6014_v38 = vpack.c.bf16 %v4790_v32, %v4782_v53  ;;  %v2038_v61 = vadd.f32 %v5983_v3, %v5970_v21  ;;  %v2042_v3 = vadd.f32 %v5990_v28, %v5976_v43 }
 0x29b   : > { %v6016_v57 = vpop.eup %4793  ;;  %4813 = vpow2.f32 %v4378_v46  ;;  %v6018_v62 = vpop.f32.mrb[48].mxu1  ;;  %4575 = vmatprep.subr.bf16.mxu0 %v6009_v45 }
 0x29c   : > { %v6021_v42 = vpop.eup %4795  ;;  %4815 = vpow2.f32 %v4391_v20  ;;  %v6023_v37 = vpop.f32.mrb[49].mxu1  ;;  %4583 = vmatprep.subr.bf16.mxu1 %v6014_v38  ;;  %4577 = vmatpush1.bf16.msra.mxu0 %v6005_v52  ;;  %v2291_v59 = vadd.f32 %v6018_v62, %v5958_v18 }
 0x29d   : > { %v6027_v60 = vpop.eup %4797  ;;  %4817 = vpow2.f32 %v4393_v8  ;;  %v6029_v58 = vpop.f32.mrb[50].mxu0  ;;  %4585 = vmatpush1.bf16.msra.mxu1 %v6002_v11  ;;  %v2293_v62 = vadd.f32 %v6023_v37, %v5958_v18 }
 0x29e   : > { %v4800_v49 = vpop.eup %4799  ;;  %4819 = vpow2.f32 %v4392_v29  ;;  %v6032_v40 = vpop.f32.mrb[51].mxu0 }
 0x29f   : > { %v4802_v6 = vpop.eup %4801  ;;  %v2731_v7 = vadd.f32 1.0, %v4800_v49  ;;  %4821 = vpow2.f32 %v4394_v22  ;;  %v6034_v19 = vpop.f32.mrb[50].mxu1  ;;  %v4408_v22 = vmul.f32 -1.442695, %v2038_v61  ;;  %v2208_v61 = vadd.f32 %v6029_v58, %v5964_v56 }
 0x2a0   : > { %v4804_v1 = vpop.eup %4803  ;;  %4823 = vpow2.f32 %v4407_v48  ;;  %v6036_v0 = vpop.f32.mrb[51].mxu1  ;;  %v6038_v5 = vpack.c.bf16 %v4802_v6, %v4792_v15  ;;  %v2131_v48 = vadd.f32 %v5996_v44, %v5976_v43  ;;  %v2202_v44 = vadd.f32 %v6007_v10, %v5958_v18 }
 0x2a1   : > { %v4806_v51 = vpop.eup %4805  ;;  %4825 = vrcp.f32 %v2731_v7  ;;  %v2732_v2 = vadd.f32 1.0, %v4804_v1  ;;  %v6040_v26 = vpop.f32.mrb[52].mxu0  ;;  %v4410_v7 = vmul.f32 -1.442695, %v2127_v12  ;;  %v2133_v1 = vadd.f32 %v5999_v24, %v5976_v43 }
 0x2a2   : > { %v4808_v27 = vpop.eup %4807  ;;  %v2734_v4 = vadd.f32 1.0, %v4806_v51  ;;  %4827 = vpow2.f32 %v4409_v63  ;;  %v6042_v35 = vpop.f32.mrb[53].mxu0 }
 0x2a3   : > { %v4810_v50 = vpop.eup %4809  ;;  %4829 = vrcp.f32 %v2732_v2  ;;  %v2687_v25 = vadd.f32 1.0, %v4808_v27  ;;  %v6044_v30 = vpop.f32.mrb[52].mxu1  ;;  %v4423_v27 = vmul.f32 -1.442695, %v2042_v3  ;;  %v4382_v3 = vmul.f32 -1.442695, %v2293_v62 }
 0x2a4   : > { %v4812_v34 = vpop.eup %4811  ;;  %4831 = vrcp.f32 %v2734_v4  ;;  %v2689_v39 = vadd.f32 1.0, %v4810_v50  ;;  %v6046_v16 = vpop.f32.mrb[53].mxu1  ;;  %v4425_v50 = vmul.f32 -1.442695, %v2131_v48 }
 0x2a5   : > { %v4814_v17 = vpop.eup %4813  ;;  %4833 = vrcp.f32 %v2687_v25  ;;  %v2688_v53 = vadd.f32 1.0, %v4812_v34  ;;  %v6048_v31 = vpop.f32.mrb[54].mxu0  ;;  %v4424_v34 = vmul.f32 -1.442695, %v2044_v13 }
 0x2a6   : > { %v4816_v55 = vpop.eup %4815  ;;  %4835 = vrcp.f32 %v2689_v39  ;;  %v2690_v36 = vadd.f32 1.0, %v4814_v17  ;;  %v6052_v33 = vpop.f32.mrb[55].mxu0  ;;  %v2204_v39 = vadd.f32 %v6012_v9, %v5958_v18 }
 0x2a7   : > { %v4818_v47 = vpop.eup %4817  ;;  %4837 = vrcp.f32 %v2688_v53  ;;  %v2703_v46 = vadd.f32 1.0, %v4816_v55  ;;  %v6054_v54 = vpop.f32.mrb[54].mxu1  ;;  %v4426_v55 = vmul.f32 -1.442695, %v2133_v1 }
 0x2a8   : > { %v4820_v23 = vpop.eup %4819  ;;  %4839 = vrcp.f32 %v2690_v36  ;;  %v2705_v20 = vadd.f32 1.0, %v4818_v47  ;;  %v6058_v32 = vpop.f32.mrb[55].mxu1  ;;  %v4379_v36 = vmul.f32 -1.442695, %v2202_v44  ;;  %v4381_v47 = vmul.f32 -1.442695, %v2291_v59 }
 0x2a9   : > { %v4822_v8 = vpop.eup %4821  ;;  %4841 = vrcp.f32 %v2703_v46  ;;  %v2704_v15 = vadd.f32 1.0, %v4820_v23  ;;  %v2297_v46 = vadd.f32 %v6034_v19, %v5964_v56  ;;  %v4380_v12 = vmul.f32 -1.442695, %v2204_v39 }
 0x2aa   : > { %v4824_v29 = vpop.eup %4823  ;;  %4843 = vrcp.f32 %v2705_v20  ;;  %v2706_v14 = vadd.f32 1.0, %v4822_v8 }
 0x2ab   : > { %v4826_v49 = vpop.eup %4825  ;;  %4845 = vrcp.f32 %v2704_v15  ;;  %v2719_v63 = vadd.f32 1.0, %v4824_v29  ;;  %v2210_v29 = vadd.f32 %v6032_v40, %v5964_v56  ;;  %v4397_v40 = vmul.f32 -1.442695, %v2297_v46 }
 0x2ac   : > { %v4828_v6 = vpop.eup %4827  ;;  %4847 = vrcp.f32 %v2706_v14  ;;  %v6069_v28 = vpack.c.bf16 %v4826_v49, %v6016_v57 }
 0x2ad   : > { %v4830_v51 = vpop.eup %4829  ;;  %4849 = vrcp.f32 %v2719_v63  ;;  %v2721_v2 = vadd.f32 1.0, %v4828_v6  ;;  %v4396_v44 = vmul.f32 -1.442695, %v2210_v29 }
 0x2ae   : > { %v4832_v4 = vpop.eup %4831  ;;  %4851 = vpow2.f32 %v4408_v22  ;;  %v6076_v25 = vpack.c.bf16 %v4830_v51, %v6021_v42  ;;  %v6078_v24 = vpop.f32.mrb[56].mxu0  ;;  %v4395_v22 = vmul.f32 -1.442695, %v2208_v61 }
 0x2af   : > { %v4834_v57 = vpop.eup %4833  ;;  %4853 = vrcp.f32 %v2721_v2  ;;  %v6083_v17 = vpack.c.bf16 %v4832_v4, %v6027_v60  ;;  %v6085_v10 = vpop.f32.mrb[57].mxu0  ;;  %v6099_v60 = vld [vmem:[%s6437_s7] sm:$0x1] }
 0x2b0   : > { %v4836_v53 = vpop.eup %4835  ;;  %4855 = vpow2.f32 %v4410_v7  ;;  %4579 = vmatprep.subr.bf16.mxu0 %v6076_v25 }
 0x2b1   : > { %v4838_v42 = vpop.eup %4837  ;;  %4857 = vpow2.f32 %v4423_v27  ;;  %4587 = vmatprep.subr.bf16.mxu1 %v6083_v17  ;;  %4581 = vmatpush1.bf16.msra.mxu0 %v6069_v28  ;;  %v6094_v9 = vpop.f32.mrb[56].mxu1 }
 0x2b2   : > { %v4840_v37 = vpop.eup %4839  ;;  %4859 = vpow2.f32 %v4425_v50  ;;  %4589 = vmatpush1.bf16.msra.mxu1 %v6038_v5  ;;  %v6104_v58 = vpop.f32.mrb[57].mxu1 }
 0x2b3   : > { %v6106_v23 = vpop.f32.mrb[58].mxu0  ;;  %v4842_v20 = vpop.eup %4841  ;;  %4861 = vpow2.f32 %v4424_v34 }
 0x2b4   : > { %v6108_v8 = vpop.f32.mrb[59].mxu0  ;;  %v4844_v15 = vpop.eup %4843  ;;  %4863 = vpow2.f32 %v4426_v55  ;;  %4435 = vmatmul.mubr.msk.f32.vlgmr.msra.gmra.mrb[64].mxu0 %vm950_vm0, %v6099_v60  ;;  %v6114_v19 = vpack.c.bf16 %v4842_v20, %v4834_v57 }
 0x2b5   : > { %v4846_v14 = vpop.eup %4845  ;;  %4865 = vpow2.f32 %v4379_v36  ;;  %4436 = vmatmul.mubr.msk.f32.vlgmr.msra.gmra.mrb[64].mxu1 %vm950_vm0, %v6099_v60  ;;  %v6118_v48 = vpop.f32.mrb[58].mxu1  ;;  %v6120_v49 = vpack.c.bf16 %v4844_v15, %v4836_v53  ;;  %3095 = vmatprep.mubr.f32.mxu0 %v6473_v41 }
 0x2b6   : > { %v4848_v63 = vpop.eup %4847  ;;  %4867 = vpow2.f32 %v4381_v47  ;;  %v6123_v13 = vpack.c.bf16 %v4846_v14, %v4838_v42  ;;  %v6125_v6 = vpop.f32.mrb[59].mxu1  ;;  %3166 = vmatprep.mubr.f32.mxu1 %v6473_v41 }
 0x2b7   : > { %v6127_v7 = vpop.f32.mrb[60].mxu0  ;;  %v6130_v1 = vpop.eup %4849  ;;  %4869 = vpow2.f32 %v4380_v12  ;;  %v6132_v51 = vpack.c.bf16 %v4848_v63, %v4840_v37 }
 0x2b8   : > { %v6134_v2 = vpop.f32.mrb[61].mxu0  ;;  %v4852_v27 = vpop.eup %4851  ;;  %4871 = vpow2.f32 %v4382_v3  ;;  %4591 = vmatprep.subr.bf16.mxu0 %v6123_v13 }
 0x2b9   : > { %v6137_v4 = vpop.eup %4853  ;;  %v2720_v50 = vadd.f32 1.0, %v4852_v27  ;;  %4873 = vpow2.f32 %v4395_v22  ;;  %4599 = vmatprep.subr.bf16.mxu1 %v6132_v51  ;;  %4593 = vmatpush1.bf16.msra.mxu0 %v6114_v19  ;;  %v6141_v59 = vpop.f32.mrb[60].mxu1  ;;  %v2299_v22 = vadd.f32 %v6036_v0, %v5964_v56  ;;  %v2216_v0 = vadd.f32 %v6042_v35, %v5970_v21 }
 0x2ba   : > { %v4856_v57 = vpop.eup %4855  ;;  %4875 = vpow2.f32 %v4397_v40  ;;  %4601 = vmatpush1.bf16.msra.mxu1 %v6120_v49  ;;  %v6144_v34 = vpop.f32.mrb[61].mxu1 }
 0x2bb   : > { %v6146_v39 = vpop.f32.mrb[62].mxu0  ;;  %v4858_v53 = vpop.eup %4857  ;;  %4877 = vrcp.f32 %v2720_v50  ;;  %v2722_v55 = vadd.f32 1.0, %v4856_v57  ;;  %v2214_v50 = vadd.f32 %v6040_v26, %v5970_v21 }
 0x2bc   : > { %v6148_v62 = vpop.f32.mrb[63].mxu0  ;;  %v4860_v42 = vpop.eup %4859  ;;  %v2735_v36 = vadd.f32 1.0, %v4858_v53  ;;  %4879 = vpow2.f32 %v4396_v44 }
 0x2bd   : > { %v4862_v61 = vpop.eup %4861  ;;  %4881 = vrcp.f32 %v2722_v55  ;;  %v2737_v37 = vadd.f32 1.0, %v4860_v42  ;;  %v6150_v47 = vpop.f32.mrb[62].mxu1  ;;  %v2303_v55 = vadd.f32 %v6044_v30, %v5970_v21 }
 0x2be   : > { %v4864_v46 = vpop.eup %4863  ;;  %4883 = vrcp.f32 %v2735_v36  ;;  %v2736_v20 = vadd.f32 1.0, %v4862_v61  ;;  %v6152_v12 = vpop.f32.mrb[63].mxu1  ;;  %v4398_v61 = vmul.f32 -1.442695, %v2299_v22  ;;  %v2309_v22 = vadd.f32 %v6054_v54, %v5976_v43 }
 0x2bf   : > { %v4866_v15 = vpop.eup %4865  ;;  %4885 = vrcp.f32 %v2737_v37  ;;  %v2738_v3 = vadd.f32 1.0, %v4864_v46  ;;  %v2380_v54 = vadd.f32 %v6078_v24, %v5958_v18 }
 0x2c0   : > { %v4868_v29 = vpop.eup %4867  ;;  %4887 = vrcp.f32 %v2736_v20  ;;  %v2691_v14 = vadd.f32 1.0, %v4866_v15  ;;  %v2305_v20 = vadd.f32 %v6046_v16, %v5970_v21  ;;  %v4411_v15 = vmul.f32 -1.442695, %v2214_v50 }
 0x2c1   : > { %v4870_v63 = vpop.eup %4869  ;;  %4889 = vrcp.f32 %v2738_v3  ;;  %v2693_v40 = vadd.f32 1.0, %v4868_v29  ;;  %v2220_v3 = vadd.f32 %v6048_v31, %v5976_v43 }
 0x2c2   : > { %v4872_v27 = vpop.eup %4871  ;;  %4891 = vrcp.f32 %v2691_v14  ;;  %v2692_v44 = vadd.f32 1.0, %v4870_v63  ;;  %v4413_v14 = vmul.f32 -1.442695, %v2303_v55  ;;  %v4412_v63 = vmul.f32 -1.442695, %v2216_v0 }
 0x2c3   : > { %v4874_v57 = vpop.eup %4873  ;;  %4893 = vrcp.f32 %v2693_v40  ;;  %v2694_v53 = vadd.f32 1.0, %v4872_v27  ;;  %v2222_v40 = vadd.f32 %v6052_v33, %v5976_v43  ;;  %v4414_v27 = vmul.f32 -1.442695, %v2305_v20 }
 0x2c4   : > { %v4876_v42 = vpop.eup %4875  ;;  %4895 = vrcp.f32 %v2692_v44  ;;  %v2707_v36 = vadd.f32 1.0, %v4874_v57  ;;  %v2311_v44 = vadd.f32 %v6058_v32, %v5976_v43  ;;  %v4427_v57 = vmul.f32 -1.442695, %v2220_v3 }
 0x2c5   : > { %v4878_v37 = vpop.eup %4877  ;;  %4897 = vrcp.f32 %v2694_v53  ;;  %v2709_v46 = vadd.f32 1.0, %v4876_v42  ;;  %v4429_v33 = vmul.f32 -1.442695, %v2309_v22  ;;  %v2469_v42 = vadd.f32 %v6094_v9, %v5958_v18 }
 0x2c6   : > { %v4880_v26 = vpop.eup %4879  ;;  %4899 = vrcp.f32 %v2707_v36  ;;  %v4383_v20 = vmul.f32 -1.442695, %v2380_v54  ;;  %v2471_v54 = vadd.f32 %v6104_v58, %v5958_v18  ;;  %v2475_v58 = vadd.f32 %v6118_v48, %v5964_v56 }
 0x2c7   : > { %v4882_v30 = vpop.eup %4881  ;;  %4901 = vrcp.f32 %v2709_v46  ;;  %v2708_v29 = vadd.f32 1.0, %v4880_v26 }
 0x2c8   : > { %v4884_v35 = vpop.eup %4883  ;;  %4903 = vpow2.f32 %v4398_v61  ;;  %v2382_v61 = vadd.f32 %v6085_v10, %v5958_v18  ;;  %v4401_v48 = vmul.f32 -1.442695, %v2475_v58 }
 0x2c9   : > { %v4886_v16 = vpop.eup %4885  ;;  %4905 = vrcp.f32 %v2708_v29  ;;  %v6173_v31 = vpack.c.bf16 %v4884_v35, %v6130_v1  ;;  %v4428_v1 = vmul.f32 -1.442695, %v2222_v40 }
 0x2ca   : > { %v4888_v50 = vpop.eup %4887  ;;  %4907 = vpow2.f32 %v4411_v15  ;;  %v6178_v53 = vpack.c.bf16 %v4886_v16, %v6137_v4  ;;  %v4430_v4 = vmul.f32 -1.442695, %v2311_v44  ;;  %v4384_v26 = vmul.f32 -1.442695, %v2382_v61 }
 0x2cb   : > { %v4890_v55 = vpop.eup %4889  ;;  %4909 = vpow2.f32 %v4413_v14  ;;  %v6182_v36 = vpack.c.bf16 %v4888_v50, %v4878_v37  ;;  %v4385_v37 = vmul.f32 -1.442695, %v2469_v42 }
 0x2cc   : > { %v4892_v32 = vpop.eup %4891  ;;  %4911 = vpow2.f32 %v4412_v63  ;;  %v6186_v0 = vpack.c.bf16 %v4890_v55, %v4882_v30 }
 0x2cd   : > { %v4894_v24 = vpop.eup %4893  ;;  %4913 = vpow2.f32 %v4414_v27  ;;  %4595 = vmatprep.subr.bf16.mxu0 %v6182_v36 }
 0x2ce   : > { %v4896_v46 = vpop.eup %4895  ;;  %4915 = vpow2.f32 %v4427_v57  ;;  %4603 = vmatprep.subr.bf16.mxu1 %v6186_v0  ;;  %4597 = vmatpush1.bf16.msra.mxu0 %v6173_v31 }
 0x2cf   : > { %v6191_v9 = vpop.eup %4897  ;;  %4917 = vpow2.f32 %v4429_v33  ;;  %4605 = vmatpush1.bf16.msra.mxu1 %v6178_v53 }
 0x2d0   : > { %v4900_v10 = vpop.eup %4899  ;;  %4919 = vpow2.f32 %v4428_v1 }
 0x2d1   : > { %v4902_v15 = vpop.eup %4901  ;;  %4921 = vpow2.f32 %v4430_v4  ;;  %4437 = vmatmul.mubr.msk.f32.vlgmr.msra.gmra.mrb[66].mxu0 %vm950_vm0, %v6099_v60  ;;  %v6196_v3 = vpack.c.bf16 %v4900_v10, %v4892_v32 }
 0x2d2   : > { %v4904_v30 = vpop.eup %4903  ;;  %4923 = vpow2.f32 %v4383_v20  ;;  %4438 = vmatmul.mubr.msk.f32.vlgmr.msra.gmra.mrb[66].mxu1 %vm950_vm0, %v6099_v60  ;;  %v6200_v29 = vpack.c.bf16 %v4902_v15, %v4894_v24  ;;  %3237 = vmatprep.mubr.f32.mxu0 %v6473_v41  ;;  %v2386_v24 = vadd.f32 %v6106_v23, %v5964_v56  ;;  %v4386_v20 = vmul.f32 -1.442695, %v2471_v54 }
 0x2d3   : > { %v4906_v14 = vpop.eup %4905  ;;  %v2710_v22 = vadd.f32 1.0, %v4904_v30  ;;  %4925 = vpow2.f32 %v4385_v37  ;;  %3308 = vmatprep.mubr.f32.mxu1 %v6473_v41  ;;  %v2388_v15 = vadd.f32 %v6108_v8, %v5964_v56 }
 0x2d4   : > { %v4908_v35 = vpop.eup %4907  ;;  %4927 = vpow2.f32 %v4384_v26  ;;  %v6204_v63 = vpack.c.bf16 %v4906_v14, %v4896_v46  ;;  %v4399_v23 = vmul.f32 -1.442695, %v2386_v24 }
 0x2d5   : > { %v4910_v40 = vpop.eup %4909  ;;  %4929 = vrcp.f32 %v2710_v22  ;;  %v2723_v16 = vadd.f32 1.0, %v4908_v35  ;;  %v2477_v22 = vadd.f32 %v6125_v6, %v5964_v56  ;;  %v2394_v56 = vadd.f32 %v6134_v2, %v5970_v21 }
 0x2d6   : > { %v4912_v27 = vpop.eup %4911  ;;  %v2725_v44 = vadd.f32 1.0, %v4910_v40  ;;  %4607 = vmatprep.subr.bf16.mxu0 %v6204_v63  ;;  %v2487_v2 = vadd.f32 %v6150_v47, %v5976_v43 }
 0x2d7   : > { %v4914_v50 = vpop.eup %4913  ;;  %4931 = vrcp.f32 %v2723_v16  ;;  %v2724_v57 = vadd.f32 1.0, %v4912_v27  ;;  %4609 = vmatpush1.bf16.msra.mxu0 %v6196_v3  ;;  %v2392_v16 = vadd.f32 %v6127_v7, %v5970_v21  ;;  %v2481_v27 = vadd.f32 %v6141_v59, %v5970_v21 }
 0x2d8   : > { %v4916_v55 = vpop.eup %4915  ;;  %4933 = vrcp.f32 %v2725_v44  ;;  %v2726_v33 = vadd.f32 1.0, %v4914_v50  ;;  %v4400_v50 = vmul.f32 -1.442695, %v2388_v15  ;;  %v2483_v7 = vadd.f32 %v6144_v34, %v5970_v21 }
 0x2d9   : > { %v4918_v42 = vpop.eup %4917  ;;  %4935 = vrcp.f32 %v2724_v57  ;;  %v2739_v32 = vadd.f32 1.0, %v4916_v55  ;;  %v4402_v57 = vmul.f32 -1.442695, %v2477_v22  ;;  %v4415_v59 = vmul.f32 -1.442695, %v2392_v16 }
 0x2da   : > { %v4920_v1 = vpop.eup %4919  ;;  %4937 = vrcp.f32 %v2726_v33  ;;  %v2741_v61 = vadd.f32 1.0, %v4918_v42  ;;  %v4417_v33 = vmul.f32 -1.442695, %v2481_v27  ;;  %v2400_v21 = vadd.f32 %v6148_v62, %v5976_v43 }
 0x2db   : > { %v4922_v4 = vpop.eup %4921  ;;  %4939 = vrcp.f32 %v2739_v32  ;;  %v2740_v46 = vadd.f32 1.0, %v4920_v1  ;;  %v4416_v32 = vmul.f32 -1.442695, %v2394_v56  ;;  %v4418_v1 = vmul.f32 -1.442695, %v2483_v7 }
 0x2dc   : > { %v4924_v37 = vpop.eup %4923  ;;  %4941 = vrcp.f32 %v2741_v61  ;;  %v2742_v18 = vadd.f32 1.0, %v4922_v4  ;;  %v4432_v62 = vmul.f32 -1.442695, %v2400_v21 }
 0x2dd   : > { %v4926_v10 = vpop.eup %4925  ;;  %4943 = vrcp.f32 %v2740_v46  ;;  %v2695_v26 = vadd.f32 1.0, %v4924_v37 }
 0x2de   : > { %v4928_v30 = vpop.eup %4927  ;;  %4945 = vrcp.f32 %v2742_v18  ;;  %v2697_v14 = vadd.f32 1.0, %v4926_v10 }
 0x2df   : > { %v4930_v35 = vpop.eup %4929  ;;  %v2696_v40 = vadd.f32 1.0, %v4928_v30  ;;  %4947 = vpow2.f32 %v4386_v20  ;;  %v4433_v20 = vmul.f32 -1.442695, %v2487_v2 }
 0x2e0   : > { %4949 = vrcp.f32 %v2695_v26  ;;  %v6223_v8 = vpack.c.bf16 %v4930_v35, %v6191_v9  ;;  %v2398_v9 = vadd.f32 %v6146_v39, %v5976_v43  ;;  %v2489_v39 = vadd.f32 %v6152_v12, %v5976_v43 }
 0x2e1   : > { %v4932_v44 = vpop.eup %4931  ;;  %4951 = vrcp.f32 %v2697_v14 }
 0x2e2   : > { %v4934_v6 = vpop.eup %4933  ;;  %4953 = vpow2.f32 %v4399_v23  ;;  %4615 = vmatprep.subr.bf16.mxu1 %v6223_v8  ;;  %v4431_v4 = vmul.f32 -1.442695, %v2398_v9  ;;  %v4434_v43 = vmul.f32 -1.442695, %v2489_v39 }
 0x2e3   : > { %v4936_v54 = vpop.eup %4935  ;;  %4955 = vrcp.f32 %v2696_v40  ;;  %4617 = vmatpush1.bf16.msra.mxu1 %v6200_v29 }
 0x2e4   : > { %v4938_v55 = vpop.eup %4937  ;;  %4957 = vpow2.f32 %v4401_v48 }
 0x2e5   : > { %v4940_v42 = vpop.eup %4939  ;;  %4959 = vpow2.f32 %v4400_v50 }
 0x2e6   : > { %v4942_v34 = vpop.eup %4941  ;;  %4961 = vpow2.f32 %v4402_v57  ;;  %v6239_v61 = vpack.c.bf16 %v4940_v42, %v4932_v44 }
 0x2e7   : > { %v4944_v24 = vpop.eup %4943  ;;  %4963 = vpow2.f32 %v4415_v59  ;;  %v6241_v46 = vpack.c.bf16 %v4942_v34, %v4934_v6 }
 0x2e8   : > { %v4946_v47 = vpop.eup %4945  ;;  %4965 = vpow2.f32 %v4417_v33  ;;  %v6243_v37 = vpack.c.bf16 %v4944_v24, %v4936_v54 }
 0x2e9   : > { %v4948_v18 = vpop.eup %4947  ;;  %4967 = vpow2.f32 %v4416_v32  ;;  %v6245_v58 = vpack.c.bf16 %v4946_v47, %v4938_v55 }
 0x2ea   : > { %v4950_v10 = vpop.eup %4949  ;;  %4969 = vpow2.f32 %v4418_v1  ;;  %4611 = vmatprep.subr.bf16.mxu0 %v6243_v37  ;;  %v2698_v15 = vadd.f32 1.0, %v4948_v18 }
 0x2eb   : > { %v4952_v12 = vpop.eup %4951  ;;  %4971 = vpow2.f32 %v4431_v4  ;;  %4619 = vmatprep.subr.bf16.mxu1 %v6245_v58  ;;  %4613 = vmatpush1.bf16.msra.mxu0 %v6239_v61 }
 0x2ec   : > { %v4954_v26 = vpop.eup %4953  ;;  %4973 = vpow2.f32 %v4433_v20  ;;  %4621 = vmatpush1.bf16.msra.mxu1 %v6241_v46 }
 0x2ed   : > { %v4956_v30 = vpop.eup %4955  ;;  %v2711_v14 = vadd.f32 1.0, %v4954_v26  ;;  %4975 = vpow2.f32 %v4432_v62 }
 0x2ee   : > { %v4958_v23 = vpop.eup %4957  ;;  %4977 = vpow2.f32 %v4434_v43  ;;  %4439 = vmatmul.mubr.msk.f32.vlgmr.msra.gmra.mrb[68].mxu0 %vm950_vm0, %v6099_v60 }
 0x2ef   : > { %v4960_v22 = vpop.eup %4959  ;;  %4979 = vrcp.f32 %v2711_v14  ;;  %v2713_v35 = vadd.f32 1.0, %v4958_v23  ;;  %4440 = vmatmul.mubr.msk.f32.vlgmr.msra.gmra.mrb[68].mxu1 %vm950_vm0, %v6099_v60  ;;  %3379 = vmatprep.mubr.f32.mxu0 %v6473_v41 }
 0x2f0   : > { %v4962_v40 = vpop.eup %4961  ;;  %4981 = vrcp.f32 %v2698_v15  ;;  %v2712_v16 = vadd.f32 1.0, %v4960_v22  ;;  %3450 = vmatprep.mubr.f32.mxu1 %v6473_v41 }
 0x2f1   : > { %v4964_v48 = vpop.eup %4963  ;;  %4983 = vrcp.f32 %v2713_v35  ;;  %v2714_v27 = vadd.f32 1.0, %v4962_v40 }
 0x2f2   : > { %v4966_v44 = vpop.eup %4965  ;;  %4985 = vrcp.f32 %v2712_v16  ;;  %v2727_v50 = vadd.f32 1.0, %v4964_v48  ;;  %v6488_v48 = vlaneseq }
 0x2f3   : > { %v4968_v56 = vpop.eup %4967  ;;  %4987 = vrcp.f32 %v2714_v27  ;;  %v2729_v6 = vadd.f32 1.0, %v4966_v44  ;;  %v6489_v44 = vld [vmem:[#allocation3_spill] sm:$0xff] }
 0x2f4   : > { %v4970_v57 = vpop.eup %4969  ;;  %4989 = vrcp.f32 %v2727_v50  ;;  %v2728_v7 = vadd.f32 1.0, %v4968_v56 }
 0x2f5   : > { %v4972_v54 = vpop.eup %4971  ;;  %4991 = vrcp.f32 %v2729_v6  ;;  %v2730_v59 = vadd.f32 1.0, %v4970_v57 }
 0x2f6   : > { %v4974_v9 = vpop.eup %4973  ;;  %4993 = vrcp.f32 %v2728_v7  ;;  %v2743_v55 = vadd.f32 1.0, %v4972_v54 }
 0x2f7   : > { %v4976_v33 = vpop.eup %4975  ;;  %4995 = vrcp.f32 %v2730_v59  ;;  %v2745_v41 = vadd.f32 1.0, %v4974_v9 }
 0x2f8   : > { %v4978_v2 = vpop.eup %4977  ;;  %4997 = vrcp.f32 %v2743_v55  ;;  %v2744_v42 = vadd.f32 1.0, %v4976_v33 }
 0x2f9   : > { %v4980_v32 = vpop.eup %4979  ;;  %4999 = vrcp.f32 %v2745_v41  ;;  %v2746_v21 = vadd.f32 1.0, %v4978_v2 }
 0x2fa   : > { %v4982_v34 = vpop.eup %4981  ;;  %5001 = vrcp.f32 %v2744_v42  ;;  %v6257_v1 = vpack.c.bf16 %v4980_v32, %v4950_v10 }
 0x2fb   : > { %v4984_v39 = vpop.eup %4983  ;;  %5003 = vrcp.f32 %v2746_v21 }
 0x2fc   : > { %v4986_v24 = vpop.eup %4985  ;;  %v6259_v4 = vpack.c.bf16 %v4984_v39, %v4952_v12 }
 0x2fd   : > { %v4988_v47 = vpop.eup %4987  ;;  %v6261_v20 = vpack.c.bf16 %v4986_v24, %v4956_v30 }
 0x2fe   : > { %v4990_v18 = vpop.eup %4989  ;;  %v6263_v62 = vpack.c.bf16 %v4988_v47, %v4982_v34 }
 0x2ff   : > { %v4992_v43 = vpop.eup %4991  ;;  %4623 = vmatprep.subr.bf16.mxu0 %v6261_v20 }
 0x300   : > { %v4994_v26 = vpop.eup %4993  ;;  %4631 = vmatprep.subr.bf16.mxu1 %v6263_v62  ;;  %4625 = vmatpush1.bf16.msra.mxu0 %v6257_v1 }
 0x301   : > { %v4996_v10 = vpop.eup %4995  ;;  %4633 = vmatpush1.bf16.msra.mxu1 %v6259_v4 }
 0x302   : > { %v4998_v15 = vpop.eup %4997 }
 0x303   : > { %v5000_v12 = vpop.eup %4999  ;;  %v6269_v14 = vpack.c.bf16 %v4998_v15, %v4990_v18 }
 0x304   : > { %v5002_v30 = vpop.eup %5001  ;;  %v6271_v23 = vpack.c.bf16 %v5000_v12, %v4992_v43 }
 0x305   : > { %v5004_v22 = vpop.eup %5003  ;;  %v6273_v35 = vpack.c.bf16 %v5002_v30, %v4994_v26 }
 0x306   : > { %v6275_v40 = vpack.c.bf16 %v5004_v22, %v4996_v10 }
 0x307   : > { %4627 = vmatprep.subr.bf16.mxu0 %v6273_v35 }
 0x308   : > { %4635 = vmatprep.subr.bf16.mxu1 %v6275_v40  ;;  %4629 = vmatpush1.bf16.msra.mxu0 %v6269_v14 }
 0x309   : > { %4637 = vmatpush1.bf16.msra.mxu1 %v6271_v23  ;;  %4639 = vmatprep.subr.bf16.mxu0 %v6009_v45 }
 0x30a   : > { %4671 = vmatprep.subr.bf16.mxu1 %v6204_v63 }
 0x30b   : > { %4441 = vmatmul.mubr.msk.f32.vlgmr.msra.gmra.mrb[70].mxu0 %vm950_vm0, %v6099_v60 }
 0x30c   : > { %4442 = vmatmul.mubr.msk.f32.vlgmr.msra.gmra.mrb[70].mxu1 %vm950_vm0, %v6099_v60 }
 0x311   : > { %4641 = vmatpush1.bf16.xpose.msra.mxu0 %v6005_v52  ;;  %v3458_v52 = vand.u32 127, %v6488_v48 }
 0x312   : > { %4673 = vmatpush1.bf16.xpose.msra.mxu1 %v6196_v3  ;;  %4643 = vmatprep.subr.bf16.mxu0 %v6076_v25  ;;  %v2880_v3 = vpop.permute.xlu0 %2879 }
 0x313   : > { %4675 = vmatprep.subr.bf16.mxu1 %v6243_v37  ;;  %v3465_v27 = vadd.s32 896, %v3458_v52  ;;  %v2885_v25 = vrot.slane %v2880_v3, %v6489_v44 }
 0x315   : > { %v3481_v50 = vand.u32 1023, %v3465_v27 }
 0x317   : > { %vm3497_vm2 = vcmp.ge.s32.totalorder %v3481_v50, 1000 }
 0x319   : > { %4645 = vmatpush1.bf16.xpose.msra.mxu0 %v6069_v28 }
 0x31a   : > { %4677 = vmatpush1.bf16.xpose.msra.mxu1 %v6239_v61  ;;  %4647 = vmatprep.subr.bf16.mxu0 %v6014_v38 }
 0x31b   : > { %4679 = vmatprep.subr.bf16.mxu1 %v6223_v8 }
 0x387   : > { %v2955_v45 = vpop.f32.mrb[64].mxu0 }
 0x388   : > { %v3026_v63 = vpop.f32.mrb[64].mxu1  ;;  %v2957_v16 = vpop.f32.mrb[65].mxu0  ;;  %v6297_v37 = vadd.f32 %v2955_v45, %v2885_v25 }
 0x389   : > { %v3028_v60 = vpop.f32.mrb[65].mxu1  ;;  %v6299_v28 = vadd.f32 %v2957_v16, %v2885_v25  ;;  %v6303_v6 = vadd.f32 %v3026_v63, %v2885_v25  ;;  %v3473_v63 = vadd.s32 1920, %v3458_v52 }
 0x38a   : > { %v6305_v57 = vadd.f32 %v3028_v60, %v2885_v25  ;;  %v3523_v9 = vsel %vm3522_vm1, %v6297_v37, -inf }
 0x38b   : > { %v3524_v41 = vsel %vm3522_vm1, %v6299_v28, -inf  ;;  %v3525_v39 = vsel %vm3522_vm1, %v6303_v6, -inf  ;;  %v3489_v16 = vand.u32 1023, %v3473_v63 }
 0x38c   : > { %v3526_v24 = vsel %vm3522_vm1, %v6305_v57, -inf }
 0x38d   : > { %vm3505_vm3 = vcmp.ge.s32.totalorder %v3489_v16, 1000 }
 0x3a4   : > { %v3097_v61 = vpop.f32.mrb[66].mxu0 }
 0x3a5   : > { %v6301_v38 = vadd.f32 %v3097_v61, %v2885_v25  ;;  %v3168_v8 = vpop.f32.mrb[66].mxu1  ;;  %v3099_v56 = vpop.f32.mrb[67].mxu0 }
 0x3a6   : > { %v6307_v7 = vadd.f32 %v3168_v8, %v2885_v25  ;;  %v6309_v54 = vadd.f32 %v3099_v56, %v2885_v25  ;;  %v3170_v59 = vpop.f32.mrb[67].mxu1 }
 0x3a7   : > { %v3527_v55 = vsel %vm3522_vm1, %v6301_v38, -inf  ;;  %v3171_v33 = vadd.f32 %v3170_v59, %v2885_v25 }
 0x3a8   : > { %v3528_v2 = vmax.f32 %v3523_v9, %v3527_v55  ;;  %v3531_v42 = vsel %vm3522_vm1, %v6307_v7, -inf  ;;  %v3529_v32 = vsel %vm3522_vm1, %v6309_v54, -inf }
 0x3a9   : > { %v3530_v21 = vmax.f32 %v3524_v41, %v3529_v32  ;;  %v6321_v34 = vsel %vm3497_vm2, -1e+30, %v3171_v33  ;;  %v3532_v18 = vmax.f32 %v3525_v39, %v3531_v42 }
 0x3aa   : > { %v3533_v47 = vsel %vm3522_vm1, %v6321_v34, -inf }
 0x3ab   : > { %v3534_v43 = vmax.f32 %v3526_v24, %v3533_v47  ;;  %v3535_v26 = vmax.f32 %v3528_v2, %v3530_v21 }
 0x3ad   : > { %v3536_v10 = vmax.f32 %v3532_v18, %v3534_v43 }
 0x3af   : > { %v3537_v15 = vmax.f32 %v3535_v26, %v3536_v10 }
 0x3b1   : > { %3538 = vmax.xlane.f32.xlu0 %v3537_v15 }
 0x3c1   : > { %v3239_v12 = vpop.f32.mrb[68].mxu0 }
 0x3c2   : > { %v3310_v30 = vpop.f32.mrb[68].mxu1  ;;  %v3241_v22 = vpop.f32.mrb[69].mxu0  ;;  %v6329_v60 = vadd.f32 %v3239_v12, %v2885_v25 }
 0x3c3   : > { %v3312_v45 = vpop.f32.mrb[69].mxu1  ;;  %v6331_v48 = vadd.f32 %v3241_v22, %v2885_v25  ;;  %v6335_v61 = vadd.f32 %v3310_v30, %v2885_v25 }
 0x3c4   : > { %v6337_v8 = vadd.f32 %v3312_v45, %v2885_v25  ;;  %v3861_v9 = vsel %vm3522_vm1, %v6329_v60, -inf }
 0x3c5   : > { %v3862_v41 = vsel %vm3522_vm1, %v6331_v48, -inf  ;;  %v3863_v24 = vsel %vm3522_vm1, %v6335_v61, -inf }
 0x3c6   : > { %v3864_v47 = vsel %vm3522_vm1, %v6337_v8, -inf }
 0x3de   : > { %v3381_v27 = vpop.f32.mrb[70].mxu0 }
 0x3df   : > { %v6333_v3 = vadd.f32 %v3381_v27, %v2885_v25  ;;  %v3452_v44 = vpop.f32.mrb[70].mxu1  ;;  %v3383_v50 = vpop.f32.mrb[71].mxu0 }
 0x3e0   : > { %v6339_v56 = vadd.f32 %v3452_v44, %v2885_v25  ;;  %v6341_v59 = vadd.f32 %v3383_v50, %v2885_v25  ;;  %v3454_v52 = vpop.f32.mrb[71].mxu1 }
 0x3e1   : > { %v3865_v55 = vsel %vm3522_vm1, %v6333_v3, -inf  ;;  %v3455_v33 = vadd.f32 %v3454_v52, %v2885_v25 }
 0x3e2   : > { %v3866_v2 = vmax.f32 %v3861_v9, %v3865_v55  ;;  %v3869_v42 = vsel %vm3522_vm1, %v6339_v56, -inf  ;;  %v3867_v32 = vsel %vm3522_vm1, %v6341_v59, -inf }
 0x3e3   : > { %v3868_v21 = vmax.f32 %v3862_v41, %v3867_v32  ;;  %v6353_v39 = vsel %vm3505_vm3, -1e+30, %v3455_v33  ;;  %v3870_v18 = vmax.f32 %v3863_v24, %v3869_v42 }
 0x3e4   : > { %v3871_v25 = vsel %vm3522_vm1, %v6353_v39, -inf }
 0x3e5   : > { %v3872_v43 = vmax.f32 %v3864_v47, %v3871_v25  ;;  %v3873_v26 = vmax.f32 %v3866_v2, %v3868_v21 }
 0x3e7   : > { %v3874_v10 = vmax.f32 %v3870_v18, %v3872_v43 }
 0x3e9   : > { %v3875_v15 = vmax.f32 %v3873_v26, %v3874_v10 }
 0x3eb   : > { %3876 = vmax.xlane.f32.xlu1 %v3875_v15 }
 0x43e   : > { %v3539_v12 = vpop.xlane.xlu0 %3538 }
 0x43f   : > { %v3540_v30 = vsub.f32 %v6297_v37, %v3539_v12  ;;  %v3541_v22 = vsub.f32 %v6299_v28, %v3539_v12  ;;  %v3542_v45 = vsub.f32 %v6303_v6, %v3539_v12  ;;  %v3543_v63 = vsub.f32 %v6305_v57, %v3539_v12 }
 0x440   : > { %v3544_v16 = vsub.f32 %v6301_v38, %v3539_v12  ;;  %v3545_v9 = vsub.f32 %v6309_v54, %v3539_v12  ;;  %v3546_v55 = vsub.f32 %v6307_v7, %v3539_v12  ;;  %v3547_v37 = vsub.f32 %v6321_v34, %v3539_v12 }
 0x441   : > { %v3548_v27 = vmul.f32 1.442695, %v3540_v30  ;;  %v3550_v44 = vmul.f32 1.442695, %v3541_v22  ;;  %v3552_v50 = vmul.f32 1.442695, %v3542_v45 }
 0x442   : > { %v3554_v52 = vmul.f32 1.442695, %v3543_v63  ;;  %v3556_v33 = vmul.f32 1.442695, %v3544_v16  ;;  %v3558_v28 = vmul.f32 1.442695, %v3545_v9 }
 0x443   : > { %5005 = vpow2.f32 %v3548_v27  ;;  %v3560_v6 = vmul.f32 1.442695, %v3546_v55  ;;  %v3562_v38 = vmul.f32 1.442695, %v3547_v37 }
 0x444   : > { %5007 = vpow2.f32 %v3550_v44 }
 0x445   : > { %5009 = vpow2.f32 %v3552_v50 }
 0x446   : > { %5011 = vpow2.f32 %v3554_v52 }
 0x447   : > { %5013 = vpow2.f32 %v3556_v33 }
 0x448   : > { %5015 = vpow2.f32 %v3558_v28 }
 0x449   : > { %5017 = vpow2.f32 %v3560_v6 }
 0x44a   : > { %5019 = vpow2.f32 %v3562_v38 }
 0x44d   : > { %v5006_v57 = vpop.eup %5005 }
 0x44e   : > { %v5008_v41 = vpop.eup %5007  ;;  %v3564_v54 = vsel %vm3522_vm1, %v5006_v57, 0.0 }
 0x44f   : > { %v5010_v2 = vpop.eup %5009  ;;  %3645 = vmatprep.mubr.f32.mxu0 %v5008_v41  ;;  %v3565_v7 = vsel %vm3522_vm1, %v5008_v41, 0.0 }
 0x450   : > { %v5012_v42 = vpop.eup %5011  ;;  %3646 = vmatmul.mubr.f32.vlgmr.msra.gmra.mrb[72].mxu0 %v5006_v57  ;;  %v3566_v32 = vadd.f32 %v3565_v7, %v3564_v54  ;;  %v3567_v34 = vsel %vm3522_vm1, %v5010_v2, 0.0 }
 0x451   : > { %4649 = vmatpush1.bf16.xpose.msra.mxu0 %v6002_v11  ;;  %3715 = vmatprep.mubr.f32.mxu0 %v5012_v42  ;;  %v5014_v21 = vpop.eup %5013  ;;  %v3569_v47 = vsel %vm3522_vm1, %v5012_v42, 0.0 }
 0x452   : > { %4651 = vmatprep.subr.bf16.mxu0 %v6083_v17  ;;  %v3568_v24 = vadd.f32 %v3567_v34, %v3566_v32  ;;  %v5016_v25 = vpop.eup %5015  ;;  %v3571_v43 = vsel %vm3522_vm1, %v5014_v21, 0.0 }
 0x453   : > { %v5018_v26 = vpop.eup %5017  ;;  %v3573_v15 = vsel %vm3522_vm1, %v5016_v25, 0.0 }
 0x454   : > { %v3570_v18 = vadd.f32 %v3569_v47, %v3568_v24  ;;  %v5020_v12 = vpop.eup %5019  ;;  %v3575_v11 = vsel %vm3522_vm1, %v5018_v26, 0.0 }
 0x455   : > { %v3577_v22 = vsel %vm3522_vm1, %v5020_v12, 0.0 }
 0x456   : > { %v3572_v10 = vadd.f32 %v3571_v43, %v3570_v18 }
 0x458   : > { %v3574_v30 = vadd.f32 %v3573_v15, %v3572_v10 }
 0x459   : > { %4653 = vmatpush1.bf16.xpose.msra.mxu0 %v6038_v5 }
 0x45a   : > { %4655 = vmatprep.subr.bf16.mxu0 %v6123_v13  ;;  %v3576_v17 = vadd.f32 %v3575_v11, %v3574_v30 }
 0x45c   : > { %v3578_v45 = vadd.f32 %v3577_v22, %v3576_v17 }
 0x45e   : > { %3579 = vadd.xlane.f32.xlu1 %v3578_v45 }
 0x460   : > { %3716 = vmatmul.mubr.f32.vlgmr.msra.gmra.mrb[72].mxu0 %v5010_v2 }
 0x461   : > { %4657 = vmatpush1.bf16.xpose.msra.mxu0 %v6114_v19  ;;  %3785 = vmatprep.mubr.f32.mxu0 %v5016_v25 }
 0x462   : > { %4659 = vmatprep.subr.bf16.mxu0 %v6182_v36 }
 0x469   : > { %4661 = vmatpush1.bf16.xpose.msra.mxu0 %v6173_v31 }
 0x46a   : > { %4663 = vmatprep.subr.bf16.mxu0 %v6132_v51 }
 0x470   : > { %3786 = vmatmul.mubr.f32.vlgmr.msra.gmra.mrb[72].mxu0 %v5014_v21 }
 0x471   : > { %4665 = vmatpush1.bf16.xpose.msra.mxu0 %v6120_v49  ;;  %3855 = vmatprep.mubr.f32.mxu0 %v5020_v12 }
 0x472   : > { %4667 = vmatprep.subr.bf16.mxu0 %v6186_v0 }
 0x478   : > { %v3877_v5 = vpop.xlane.xlu1 %3876 }
 0x479   : > { %v3878_v13 = vsub.f32 %v6329_v60, %v3877_v5  ;;  %v3879_v63 = vsub.f32 %v6331_v48, %v3877_v5  ;;  %v3880_v19 = vsub.f32 %v6335_v61, %v3877_v5  ;;  %v3881_v16 = vsub.f32 %v6337_v8, %v3877_v5  ;;  %4669 = vmatpush1.bf16.xpose.msra.mxu0 %v6178_v53 }
 0x47a   : > { %v3882_v31 = vsub.f32 %v6333_v3, %v3877_v5  ;;  %v3883_v44 = vsub.f32 %v6341_v59, %v3877_v5  ;;  %v3884_v0 = vsub.f32 %v6339_v56, %v3877_v5  ;;  %v3885_v48 = vsub.f32 %v6353_v39, %v3877_v5 }
 0x47b   : > { %v3886_v51 = vmul.f32 1.442695, %v3878_v13  ;;  %v3888_v36 = vmul.f32 1.442695, %v3879_v63  ;;  %v3890_v27 = vmul.f32 1.442695, %v3880_v19 }
 0x47c   : > { %v3892_v49 = vmul.f32 1.442695, %v3881_v16  ;;  %v3894_v60 = vmul.f32 1.442695, %v3882_v31  ;;  %v3896_v61 = vmul.f32 1.442695, %v3883_v44 }
 0x47d   : > { %5021 = vpow2.f32 %v3886_v51  ;;  %v3898_v53 = vmul.f32 1.442695, %v3884_v0  ;;  %v3900_v3 = vmul.f32 1.442695, %v3885_v48 }
 0x47e   : > { %5023 = vpow2.f32 %v3888_v36 }
 0x47f   : > { %5025 = vpow2.f32 %v3890_v27 }
 0x480   : > { %5027 = vpow2.f32 %v3892_v49  ;;  %3856 = vmatmul.mubr.f32.vlgmr.msra.gmra.mrb[72].mxu0 %v5018_v26 }
 0x481   : > { %5029 = vpow2.f32 %v3894_v60 }
 0x482   : > { %5031 = vpow2.f32 %v3896_v61 }
 0x483   : > { %5033 = vpow2.f32 %v3898_v53 }
 0x484   : > { %5035 = vpow2.f32 %v3900_v3 }
 0x487   : > { %v5022_v8 = vpop.eup %5021 }
 0x488   : > { %v5024_v50 = vpop.eup %5023  ;;  %v3902_v59 = vsel %vm3522_vm1, %v5022_v8, 0.0 }
 0x489   : > { %v5026_v52 = vpop.eup %5025  ;;  %3983 = vmatprep.mubr.f32.mxu1 %v5024_v50  ;;  %v3903_v56 = vsel %vm3522_vm1, %v5024_v50, 0.0 }
 0x48a   : > { %v5028_v9 = vpop.eup %5027  ;;  %3984 = vmatmul.mubr.f32.vlgmr.msra.gmra.mrb[72].mxu1 %v5022_v8  ;;  %v3904_v55 = vadd.f32 %v3903_v56, %v3902_v59  ;;  %v3905_v39 = vsel %vm3522_vm1, %v5026_v52, 0.0 }
 0x48b   : > { %4681 = vmatpush1.bf16.xpose.msra.mxu1 %v6200_v29  ;;  %4053 = vmatprep.mubr.f32.mxu1 %v5028_v9  ;;  %v5030_v33 = vpop.eup %5029  ;;  %v3907_v28 = vsel %vm3522_vm1, %v5028_v9, 0.0 }
 0x48c   : > { %4683 = vmatprep.subr.bf16.mxu1 %v6245_v58  ;;  %v3906_v37 = vadd.f32 %v3905_v39, %v3904_v55  ;;  %v5032_v6 = vpop.eup %5031  ;;  %v3909_v57 = vsel %vm3522_vm1, %v5030_v33, 0.0 }
 0x48d   : > { %v5034_v41 = vpop.eup %5033  ;;  %v3911_v2 = vsel %vm3522_vm1, %v5032_v6, 0.0 }
 0x48e   : > { %v3908_v38 = vadd.f32 %v3907_v28, %v3906_v37  ;;  %v5036_v7 = vpop.eup %5035  ;;  %v3913_v29 = vsel %vm3522_vm1, %v5034_v41, 0.0 }
 0x48f   : > { %v3915_v32 = vsel %vm3522_vm1, %v5036_v7, 0.0 }
 0x490   : > { %v3910_v54 = vadd.f32 %v3909_v57, %v3908_v38 }
 0x492   : > { %v3912_v42 = vadd.f32 %v3911_v2, %v3910_v54 }
 0x493   : > { %4685 = vmatpush1.bf16.xpose.msra.mxu1 %v6241_v46 }
 0x494   : > { %4687 = vmatprep.subr.bf16.mxu1 %v6261_v20  ;;  %v3914_v58 = vadd.f32 %v3913_v29, %v3912_v42 }
 0x496   : > { %v3916_v34 = vadd.f32 %v3915_v32, %v3914_v58 }
 0x498   : > { %3917 = vadd.xlane.f32.xlu0 %v3916_v34 }
 0x49a   : > { %4054 = vmatmul.mubr.f32.vlgmr.msra.gmra.mrb[72].mxu1 %v5026_v52 }
 0x49b   : > { %4689 = vmatpush1.bf16.xpose.msra.mxu1 %v6257_v1  ;;  %4123 = vmatprep.mubr.f32.mxu1 %v5032_v6 }
 0x49c   : > { %4691 = vmatprep.subr.bf16.mxu1 %v6273_v35 }
 0x4a3   : > { %4693 = vmatpush1.bf16.xpose.msra.mxu1 %v6269_v14 }
 0x4a4   : > { %4695 = vmatprep.subr.bf16.mxu1 %v6263_v62 }
 0x4aa   : > { %4124 = vmatmul.mubr.f32.vlgmr.msra.gmra.mrb[72].mxu1 %v5030_v33 }
 0x4ab   : > { %4697 = vmatpush1.bf16.xpose.msra.mxu1 %v6259_v4  ;;  %4193 = vmatprep.mubr.f32.mxu1 %v5036_v7 }
 0x4ac   : > { %4699 = vmatprep.subr.bf16.mxu1 %v6275_v40 }
 0x4b3   : > { %4701 = vmatpush1.bf16.xpose.msra.mxu1 %v6271_v23 }
 0x4ba   : > { %4194 = vmatmul.mubr.f32.vlgmr.msra.gmra.mrb[72].mxu1 %v5034_v41 }
 0x4eb   : > { %v3580_v1 = vpop.xlane.xlu1 %3579 }
 0x525   : > { %v3918_v46 = vpop.xlane.xlu0 %3917 }
 0x526   : > { %v4204_v20 = vrot.slane %v3918_v46, 7 }
 0x528   : > { %v4206_v21 = vsel %vm3522_vm1, %v3580_v1, %v4204_v20 }
 0x529   : > { %4209 = vperm.xlu0 %4748, %v4206_v21  }
 0x553   : > { %v3857_v35 = vpop.f32.mrb[72].mxu0 }
 0x554   : > { %v3859_v14 = vpop.f32.mrb[73].mxu0 }
 0x58d   : > { %v4195_v24 = vpop.f32.mrb[72].mxu1 }
 0x58e   : > { %v4200_v62 = vrot.slane %v4195_v24, 7  ;;  %v4197_v47 = vpop.f32.mrb[73].mxu1 }
 0x590   : > { %v4202_v4 = vsel %vm3522_vm1, %v3857_v35, %v4200_v62 }
 0x5a8   : > { %v4210_v25 = vpop.permute.xlu0 %4209 }
 0x5a9   : > { %5037 = vrcp.f32 %v4210_v25 }
 0x5b3   : > { %v5038_v40 = vpop.eup %5037 }
 0x5b4   : > { %v4213_v23 = vmul.f32 %v5038_v40, %v4202_v4 }
 0x5b6   : > { %4215 = vst.msk [vmem:[%s366_s17] sm:$0x3] %vm4214_vm4, %v4213_v23 }
 0x5b7 PF: > { %s21_s13 = sadd.s32 1, %s5061_s13   ;;  %s6490_s11 = smov %s5057_s12 }
 0x5b8   : > { %p18_p5 = scmp.ge.s32.totalorder %s21_s13, 4   ;;  %s6491_s12 = smov %s6493_s8 }
 0x5ba   :  { %20 = sbr.rel (!%p18_p5) target bundleno = 3 (0x3), region = 89 }

</bundles_post_ra>
